<compile_context>
chip_gen: v7x
topology: tpu7x:2x2x1
jax: 0.10.0
libtpu: 0.0.40
codegen_flags: <defaults>
</compile_context>

<pallas_src>
import math
import jax
import jax.numpy as jnp
from jax.experimental import pallas as pl
from jax.experimental.pallas import tpu as pltpu  # noqa: F401  (TPU backend import)

B, S, D, H, DFF = 2, 8, 32, 4, 64
DK = D // H
EPS = 1e-6
NEG = -1e9


def _layernorm(x, a, b):
    # torch: a_2 * (x - mean) / (std + eps) + b_2, std is unbiased (ddof=1)
    mean = jnp.mean(x, axis=-1, keepdims=True)
    var = jnp.sum((x - mean) ** 2, axis=-1, keepdims=True) * (1.0 / (x.shape[-1] - 1))
    std = jnp.sqrt(var)
    return a * (x - mean) / (std + EPS) + b


def encoder_layer_kernel(x_ref, mask_ref,
                         ln1a_ref, ln1b_ref,
                         wqkv_ref, bqkv_ref, wo_ref, bo_ref,
                         ln2a_ref, ln2b_ref,
                         w1_ref, b1_ref, w2_ref, b2_ref,
                         o_ref):
    # x_ref: (B*S, D) flattened activations, mask_ref: (B, S) with 1=attend, 0=masked
    x = x_ref[...]                                        # (B*S, D)

    # ---- sublayer 0: multi-head self-attention on LayerNorm(x) ----
    y = _layernorm(x, ln1a_ref[...], ln1b_ref[...])       # all B*S rows at once

    # fused QKV projection: one (B*S, D) @ (D, 3D) matmul instead of three
    qkv = jnp.dot(y, wqkv_ref[...], preferred_element_type=jnp.float32) + bqkv_ref[...]

    # additive mask bias, computed ONCE (hoisted out of the batch/head loops)
    mask_bias = jnp.where(mask_ref[...] == 0.0, NEG, 0.0)  # (B, S)

    scale = 1.0 / math.sqrt(DK)
    wo = wo_ref[...]
    attn_rows = []
    for b in range(B):                       # static loops (B=2, H=4): no 3-D transpose
        r0 = b * S
        bias_b = mask_bias[b:b + 1, :]       # (1, S) broadcasts over query rows
        acc = jnp.zeros((S, D), jnp.float32)
        for h in range(H):
            qh = qkv[r0:r0 + S, h * DK:(h + 1) * DK]
            kh = qkv[r0:r0 + S, D + h * DK:D + (h + 1) * DK]
            vh = qkv[r0:r0 + S, 2 * D + h * DK:2 * D + (h + 1) * DK]
            scores = jnp.dot(qh, kh.T, preferred_element_type=jnp.float32) * scale
            scores = scores + bias_b
            scores = scores - jnp.max(scores, axis=-1, keepdims=True)
            p = jnp.exp(scores)
            p = p / jnp.sum(p, axis=-1, keepdims=True)
            head = jnp.dot(p, vh, preferred_element_type=jnp.float32)      # (S, DK)
            # fold head straight into the output projection (no lane-axis concat)
            acc = acc + jnp.dot(head, wo[h * DK:(h + 1) * DK, :],
                                preferred_element_type=jnp.float32)
        attn_rows.append(acc)
    attn = jnp.concatenate(attn_rows, axis=0)            # sublane-axis concat, (B*S, D)
    x1 = x + attn + bo_ref[...]

    # ---- sublayer 1: position-wise feed-forward on LayerNorm(x1), all rows at once ----
    y2 = _layernorm(x1, ln2a_ref[...], ln2b_ref[...])
    hdn = jnp.maximum(
        jnp.dot(y2, w1_ref[...], preferred_element_type=jnp.float32) + b1_ref[...], 0.0)
    ff = jnp.dot(hdn, w2_ref[...], preferred_element_type=jnp.float32) + b2_ref[...]
    o_ref[...] = x1 + ff


def encoder_layer(x, mask, params):
    (ln1a, ln1b, wq, bq, wk, bk, wv, bv, wo, bo, ln2a, ln2b, w1, b1, w2, b2) = params

    # Fuse QKV weights/biases outside the kernel (free in the XLA wrapper).
    wqkv = jnp.concatenate([wq, wk, wv], axis=1)          # (D, 3D)
    bqkv = jnp.concatenate([bq, bk, bv], axis=1)          # (1, 3D)

    x_flat = x.reshape(B * S, D)                          # (16, 32)
    mask2d = mask.reshape(B, S)                           # (2, 8)

    # No grid: a single kernel invocation, every operand (a few KB total) resident
    # in VMEM as a full block. Avoids serial grid-step overhead entirely.
    out_flat = pl.pallas_call(
        encoder_layer_kernel,
        out_shape=jax.ShapeDtypeStruct((B * S, D), jnp.float32),
    )(x_flat, mask2d, ln1a, ln1b, wqkv, bqkv, wo, bo, ln2a, ln2b, w1, b1, w2, b2)

    return out_flat.reshape(B, S, D)


def encoder_layer_ref(x, mask, params):
    # pure-JAX reference of the same math, for correctness checking
    (ln1a, ln1b, wq, bq, wk, bk, wv, bv, wo, bo, ln2a, ln2b, w1, b1, w2, b2) = params
    out = []
    for b in range(B):
        xb = x[b]
        mb = mask[b]
        y = _layernorm(xb, ln1a, ln1b)
        q, k, v = y @ wq + bq, y @ wk + bk, y @ wv + bv
        heads = []
        for h in range(H):
            qh, kh, vh = (t[:, h * DK:(h + 1) * DK] for t in (q, k, v))
            sc = (qh @ kh.T) / math.sqrt(DK)
            sc = jnp.where(mb == 0, NEG, sc)
            heads.append(jax.nn.softmax(sc, axis=-1) @ vh)
        x1 = xb + (jnp.concatenate(heads, axis=-1) @ wo + bo)
        y2 = _layernorm(x1, ln2a, ln2b)
        out.append(x1 + jnp.maximum(y2 @ w1 + b1, 0.0) @ w2 + b2)
    return jnp.stack(out, axis=0)


def make_params(key):
    ks = jax.random.split(key, 8)
    def lin(k, din, dout):
        kw, kb = jax.random.split(k)
        w = jax.random.normal(kw, (din, dout), jnp.float32) * (1.0 / math.sqrt(din))
        b = jax.random.normal(kb, (1, dout), jnp.float32) * 0.02
        return w, b
    ln1a = jnp.ones((1, D), jnp.float32)
    ln1b = jnp.zeros((1, D), jnp.float32)
    ln2a = jnp.ones((1, D), jnp.float32)
    ln2b = jnp.zeros((1, D), jnp.float32)
    wq, bq = lin(ks[0], D, D)
    wk, bk = lin(ks[1], D, D)
    wv, bv = lin(ks[2], D, D)
    wo, bo = lin(ks[3], D, D)
    w1, b1 = lin(ks[4], D, DFF)
    w2, b2 = lin(ks[5], DFF, D)
    return (ln1a, ln1b, wq, bq, wk, bk, wv, bv, wo, bo, ln2a, ln2b, w1, b1, w2, b2)


if __name__ == "__main__":
    key = jax.random.PRNGKey(0)
    kx, kp = jax.random.split(key)
    x = jax.random.normal(kx, (B, S, D), jnp.float32)
    # mask: last 2 positions of batch 1 are padding (0 = masked)
    mask = jnp.ones((B, 1, S), jnp.float32).at[1, 0, S - 2:].set(0.0)
    params = make_params(kp)

    out = jax.block_until_ready(encoder_layer(x, mask, params))
    ref = encoder_layer_ref(x, mask, params)
    assert out.shape == (B, S, D)
    assert jnp.allclose(out, ref, atol=1e-4, rtol=1e-4), float(jnp.max(jnp.abs(out - ref)))
    print("KERNEL_OK")
</pallas_src>

<mosaic_0001>
module attributes {stable_mosaic.version = 11 : i64} {
  func.func @encoder_layer_kernel(%arg0: memref<16x32xf32, #tpu.memory_space<vmem>>, %arg1: memref<2x8xf32, #tpu.memory_space<vmem>>, %arg2: memref<1x32xf32, #tpu.memory_space<vmem>>, %arg3: memref<1x32xf32, #tpu.memory_space<vmem>>, %arg4: memref<32x96xf32, #tpu.memory_space<vmem>>, %arg5: memref<1x96xf32, #tpu.memory_space<vmem>>, %arg6: memref<32x32xf32, #tpu.memory_space<vmem>>, %arg7: memref<1x32xf32, #tpu.memory_space<vmem>>, %arg8: memref<1x32xf32, #tpu.memory_space<vmem>>, %arg9: memref<1x32xf32, #tpu.memory_space<vmem>>, %arg10: memref<32x64xf32, #tpu.memory_space<vmem>>, %arg11: memref<1x64xf32, #tpu.memory_space<vmem>>, %arg12: memref<64x32xf32, #tpu.memory_space<vmem>>, %arg13: memref<1x32xf32, #tpu.memory_space<vmem>>, %arg14: memref<16x32xf32, #tpu.memory_space<vmem>>) attributes {dimension_semantics = [], scalar_prefetch = 0 : i64, scratch_operands = 0 : i64, tpu.core_type = #tpu.core_type<tc>} {
    %c0 = arith.constant 0 : index
    %c0_0 = arith.constant 0 : index
    %0 = vector.load %arg0[%c0, %c0_0] : memref<16x32xf32, #tpu.memory_space<vmem>>, vector<16x32xf32>
    %c0_1 = arith.constant 0 : index
    %c0_2 = arith.constant 0 : index
    %1 = vector.load %arg2[%c0_1, %c0_2] : memref<1x32xf32, #tpu.memory_space<vmem>>, vector<1x32xf32>
    %c0_3 = arith.constant 0 : index
    %c0_4 = arith.constant 0 : index
    %2 = vector.load %arg3[%c0_3, %c0_4] : memref<1x32xf32, #tpu.memory_space<vmem>>, vector<1x32xf32>
    %cst = arith.constant dense<0.000000e+00> : vector<16xf32>
    %3 = vector.multi_reduction <add>, %0, %cst [1] : vector<16x32xf32> to vector<16xf32>
    %4 = vector.shape_cast %3 : vector<16xf32> to vector<16x1xf32>
    %cst_5 = arith.constant 3.200000e+01 : f32
    %5 = vector.broadcast %cst_5 : f32 to vector<16x1xf32>
    %6 = arith.divf %4, %5 : vector<16x1xf32>
    %7 = vector.broadcast %6 : vector<16x1xf32> to vector<16x32xf32>
    %8 = arith.subf %0, %7 : vector<16x32xf32>
    %9 = arith.mulf %8, %8 : vector<16x32xf32>
    %cst_6 = arith.constant dense<0.000000e+00> : vector<16xf32>
    %10 = vector.multi_reduction <add>, %9, %cst_6 [1] : vector<16x32xf32> to vector<16xf32>
    %11 = vector.shape_cast %10 : vector<16xf32> to vector<16x1xf32>
    %cst_7 = arith.constant 0.0322580636 : f32
    %12 = vector.broadcast %cst_7 : f32 to vector<16x1xf32>
    %13 = arith.mulf %11, %12 : vector<16x1xf32>
    %14 = math.sqrt %13 : vector<16x1xf32>
    %15 = vector.broadcast %6 : vector<16x1xf32> to vector<16x32xf32>
    %16 = arith.subf %0, %15 : vector<16x32xf32>
    %17 = vector.broadcast %1 : vector<1x32xf32> to vector<16x32xf32>
    %18 = arith.mulf %17, %16 : vector<16x32xf32>
    %cst_8 = arith.constant 9.99999997E-7 : f32
    %19 = vector.broadcast %cst_8 : f32 to vector<16x1xf32>
    %20 = arith.addf %14, %19 : vector<16x1xf32>
    %21 = vector.broadcast %20 : vector<16x1xf32> to vector<16x32xf32>
    %22 = arith.divf %18, %21 : vector<16x32xf32>
    %23 = vector.broadcast %2 : vector<1x32xf32> to vector<16x32xf32>
    %24 = arith.addf %22, %23 : vector<16x32xf32>
    %c0_9 = arith.constant 0 : index
    %c0_10 = arith.constant 0 : index
    %25 = vector.load %arg4[%c0_9, %c0_10] : memref<32x96xf32, #tpu.memory_space<vmem>>, vector<32x96xf32>
    %cst_11 = arith.constant dense<0.000000e+00> : vector<16x96xf32>
    %26 = tpu.matmul %24, %25, %cst_11 {dimension_numbers = #tpu.dot_dimension_numbers<[1], [0], [0], [1], [0, 0, 1, 1], [], []>} : vector<16x32xf32>, vector<32x96xf32>, vector<16x96xf32> -> vector<16x96xf32>
    %c0_12 = arith.constant 0 : index
    %c0_13 = arith.constant 0 : index
    %27 = vector.load %arg5[%c0_12, %c0_13] : memref<1x96xf32, #tpu.memory_space<vmem>>, vector<1x96xf32>
    %28 = vector.broadcast %27 : vector<1x96xf32> to vector<16x96xf32>
    %29 = arith.addf %26, %28 : vector<16x96xf32>
    %c0_14 = arith.constant 0 : index
    %c0_15 = arith.constant 0 : index
    %30 = vector.load %arg1[%c0_14, %c0_15] : memref<2x8xf32, #tpu.memory_space<vmem>>, vector<2x8xf32>
    %cst_16 = arith.constant 0.000000e+00 : f32
    %31 = vector.broadcast %cst_16 : f32 to vector<2x8xf32>
    %32 = arith.cmpf oeq, %30, %31 : vector<2x8xf32>
    %cst_17 = arith.constant -1.000000e+09 : f32
    %cst_18 = arith.constant 0.000000e+00 : f32
    %33 = vector.broadcast %cst_17 : f32 to vector<2x8xf32>
    %34 = vector.broadcast %cst_18 : f32 to vector<2x8xf32>
    %35 = arith.select %32, %33, %34 : vector<2x8xi1>, vector<2x8xf32>
    %c0_19 = arith.constant 0 : index
    %c0_20 = arith.constant 0 : index
    %36 = vector.load %arg6[%c0_19, %c0_20] : memref<32x32xf32, #tpu.memory_space<vmem>>, vector<32x32xf32>
    %37 = vector.extract_strided_slice %35 {offsets = [0, 0], sizes = [1, 8], strides = [1, 1]} : vector<2x8xf32> to vector<1x8xf32>
    %cst_21 = arith.constant 0.000000e+00 : f32
    %38 = vector.broadcast %cst_21 : f32 to vector<8x32xf32>
    %39 = vector.extract_strided_slice %29 {offsets = [0, 0], sizes = [8, 8], strides = [1, 1]} : vector<16x96xf32> to vector<8x8xf32>
    %40 = vector.extract_strided_slice %29 {offsets = [0, 32], sizes = [8, 8], strides = [1, 1]} : vector<16x96xf32> to vector<8x8xf32>
    %41 = vector.extract_strided_slice %29 {offsets = [0, 64], sizes = [8, 8], strides = [1, 1]} : vector<16x96xf32> to vector<8x8xf32>
    %42 = tpu.transpose %40, [1, 0] : vector<8x8xf32> -> vector<8x8xf32>
    %cst_22 = arith.constant dense<0.000000e+00> : vector<8x8xf32>
    %43 = tpu.matmul %39, %42, %cst_22 {dimension_numbers = #tpu.dot_dimension_numbers<[1], [0], [0], [1], [0, 0, 1, 1], [], []>} : vector<8x8xf32>, vector<8x8xf32>, vector<8x8xf32> -> vector<8x8xf32>
    %cst_23 = arith.constant 0.353553385 : f32
    %44 = vector.broadcast %cst_23 : f32 to vector<8x8xf32>
    %45 = arith.mulf %43, %44 : vector<8x8xf32>
    %46 = vector.broadcast %37 : vector<1x8xf32> to vector<8x8xf32>
    %47 = arith.addf %45, %46 : vector<8x8xf32>
    %cst_24 = arith.constant dense<0xFF800000> : vector<8xf32>
    %48 = vector.multi_reduction <maximumf>, %47, %cst_24 [1] : vector<8x8xf32> to vector<8xf32>
    %49 = vector.shape_cast %48 : vector<8xf32> to vector<8x1xf32>
    %50 = vector.broadcast %49 : vector<8x1xf32> to vector<8x8xf32>
    %51 = arith.subf %47, %50 : vector<8x8xf32>
    %52 = math.exp %51 : vector<8x8xf32>
    %cst_25 = arith.constant dense<0.000000e+00> : vector<8xf32>
    %53 = vector.multi_reduction <add>, %52, %cst_25 [1] : vector<8x8xf32> to vector<8xf32>
    %54 = vector.shape_cast %53 : vector<8xf32> to vector<8x1xf32>
    %55 = vector.broadcast %54 : vector<8x1xf32> to vector<8x8xf32>
    %56 = arith.divf %52, %55 : vector<8x8xf32>
    %cst_26 = arith.constant dense<0.000000e+00> : vector<8x8xf32>
    %57 = tpu.matmul %56, %41, %cst_26 {dimension_numbers = #tpu.dot_dimension_numbers<[1], [0], [0], [1], [0, 0, 1, 1], [], []>} : vector<8x8xf32>, vector<8x8xf32>, vector<8x8xf32> -> vector<8x8xf32>
    %58 = vector.extract_strided_slice %36 {offsets = [0, 0], sizes = [8, 32], strides = [1, 1]} : vector<32x32xf32> to vector<8x32xf32>
    %cst_27 = arith.constant dense<0.000000e+00> : vector<8x32xf32>
    %59 = tpu.matmul %57, %58, %cst_27 {dimension_numbers = #tpu.dot_dimension_numbers<[1], [0], [0], [1], [0, 0, 1, 1], [], []>} : vector<8x8xf32>, vector<8x32xf32>, vector<8x32xf32> -> vector<8x32xf32>
    %60 = arith.addf %38, %59 : vector<8x32xf32>
    %61 = vector.extract_strided_slice %29 {offsets = [0, 8], sizes = [8, 8], strides = [1, 1]} : vector<16x96xf32> to vector<8x8xf32>
    %62 = vector.extract_strided_slice %29 {offsets = [0, 40], sizes = [8, 8], strides = [1, 1]} : vector<16x96xf32> to vector<8x8xf32>
    %63 = vector.extract_strided_slice %29 {offsets = [0, 72], sizes = [8, 8], strides = [1, 1]} : vector<16x96xf32> to vector<8x8xf32>
    %64 = tpu.transpose %62, [1, 0] : vector<8x8xf32> -> vector<8x8xf32>
    %cst_28 = arith.constant dense<0.000000e+00> : vector<8x8xf32>
    %65 = tpu.matmul %61, %64, %cst_28 {dimension_numbers = #tpu.dot_dimension_numbers<[1], [0], [0], [1], [0, 0, 1, 1], [], []>} : vector<8x8xf32>, vector<8x8xf32>, vector<8x8xf32> -> vector<8x8xf32>
    %cst_29 = arith.constant 0.353553385 : f32
    %66 = vector.broadcast %cst_29 : f32 to vector<8x8xf32>
    %67 = arith.mulf %65, %66 : vector<8x8xf32>
    %68 = vector.broadcast %37 : vector<1x8xf32> to vector<8x8xf32>
    %69 = arith.addf %67, %68 : vector<8x8xf32>
    %cst_30 = arith.constant dense<0xFF800000> : vector<8xf32>
    %70 = vector.multi_reduction <maximumf>, %69, %cst_30 [1] : vector<8x8xf32> to vector<8xf32>
    %71 = vector.shape_cast %70 : vector<8xf32> to vector<8x1xf32>
    %72 = vector.broadcast %71 : vector<8x1xf32> to vector<8x8xf32>
    %73 = arith.subf %69, %72 : vector<8x8xf32>
    %74 = math.exp %73 : vector<8x8xf32>
    %cst_31 = arith.constant dense<0.000000e+00> : vector<8xf32>
    %75 = vector.multi_reduction <add>, %74, %cst_31 [1] : vector<8x8xf32> to vector<8xf32>
    %76 = vector.shape_cast %75 : vector<8xf32> to vector<8x1xf32>
    %77 = vector.broadcast %76 : vector<8x1xf32> to vector<8x8xf32>
    %78 = arith.divf %74, %77 : vector<8x8xf32>
    %cst_32 = arith.constant dense<0.000000e+00> : vector<8x8xf32>
    %79 = tpu.matmul %78, %63, %cst_32 {dimension_numbers = #tpu.dot_dimension_numbers<[1], [0], [0], [1], [0, 0, 1, 1], [], []>} : vector<8x8xf32>, vector<8x8xf32>, vector<8x8xf32> -> vector<8x8xf32>
    %80 = vector.extract_strided_slice %36 {offsets = [8, 0], sizes = [8, 32], strides = [1, 1]} : vector<32x32xf32> to vector<8x32xf32>
    %cst_33 = arith.constant dense<0.000000e+00> : vector<8x32xf32>
    %81 = tpu.matmul %79, %80, %cst_33 {dimension_numbers = #tpu.dot_dimension_numbers<[1], [0], [0], [1], [0, 0, 1, 1], [], []>} : vector<8x8xf32>, vector<8x32xf32>, vector<8x32xf32> -> vector<8x32xf32>
    %82 = arith.addf %60, %81 : vector<8x32xf32>
    %83 = vector.extract_strided_slice %29 {offsets = [0, 16], sizes = [8, 8], strides = [1, 1]} : vector<16x96xf32> to vector<8x8xf32>
    %84 = vector.extract_strided_slice %29 {offsets = [0, 48], sizes = [8, 8], strides = [1, 1]} : vector<16x96xf32> to vector<8x8xf32>
    %85 = vector.extract_strided_slice %29 {offsets = [0, 80], sizes = [8, 8], strides = [1, 1]} : vector<16x96xf32> to vector<8x8xf32>
    %86 = tpu.transpose %84, [1, 0] : vector<8x8xf32> -> vector<8x8xf32>
    %cst_34 = arith.constant dense<0.000000e+00> : vector<8x8xf32>
    %87 = tpu.matmul %83, %86, %cst_34 {dimension_numbers = #tpu.dot_dimension_numbers<[1], [0], [0], [1], [0, 0, 1, 1], [], []>} : vector<8x8xf32>, vector<8x8xf32>, vector<8x8xf32> -> vector<8x8xf32>
    %cst_35 = arith.constant 0.353553385 : f32
    %88 = vector.broadcast %cst_35 : f32 to vector<8x8xf32>
    %89 = arith.mulf %87, %88 : vector<8x8xf32>
    %90 = vector.broadcast %37 : vector<1x8xf32> to vector<8x8xf32>
    %91 = arith.addf %89, %90 : vector<8x8xf32>
    %cst_36 = arith.constant dense<0xFF800000> : vector<8xf32>
    %92 = vector.multi_reduction <maximumf>, %91, %cst_36 [1] : vector<8x8xf32> to vector<8xf32>
    %93 = vector.shape_cast %92 : vector<8xf32> to vector<8x1xf32>
    %94 = vector.broadcast %93 : vector<8x1xf32> to vector<8x8xf32>
    %95 = arith.subf %91, %94 : vector<8x8xf32>
    %96 = math.exp %95 : vector<8x8xf32>
    %cst_37 = arith.constant dense<0.000000e+00> : vector<8xf32>
    %97 = vector.multi_reduction <add>, %96, %cst_37 [1] : vector<8x8xf32> to vector<8xf32>
    %98 = vector.shape_cast %97 : vector<8xf32> to vector<8x1xf32>
    %99 = vector.broadcast %98 : vector<8x1xf32> to vector<8x8xf32>
    %100 = arith.divf %96, %99 : vector<8x8xf32>
    %cst_38 = arith.constant dense<0.000000e+00> : vector<8x8xf32>
    %101 = tpu.matmul %100, %85, %cst_38 {dimension_numbers = #tpu.dot_dimension_numbers<[1], [0], [0], [1], [0, 0, 1, 1], [], []>} : vector<8x8xf32>, vector<8x8xf32>, vector<8x8xf32> -> vector<8x8xf32>
    %102 = vector.extract_strided_slice %36 {offsets = [16, 0], sizes = [8, 32], strides = [1, 1]} : vector<32x32xf32> to vector<8x32xf32>
    %cst_39 = arith.constant dense<0.000000e+00> : vector<8x32xf32>
    %103 = tpu.matmul %101, %102, %cst_39 {dimension_numbers = #tpu.dot_dimension_numbers<[1], [0], [0], [1], [0, 0, 1, 1], [], []>} : vector<8x8xf32>, vector<8x32xf32>, vector<8x32xf32> -> vector<8x32xf32>
    %104 = arith.addf %82, %103 : vector<8x32xf32>
    %105 = vector.extract_strided_slice %29 {offsets = [0, 24], sizes = [8, 8], strides = [1, 1]} : vector<16x96xf32> to vector<8x8xf32>
    %106 = vector.extract_strided_slice %29 {offsets = [0, 56], sizes = [8, 8], strides = [1, 1]} : vector<16x96xf32> to vector<8x8xf32>
    %107 = vector.extract_strided_slice %29 {offsets = [0, 88], sizes = [8, 8], strides = [1, 1]} : vector<16x96xf32> to vector<8x8xf32>
    %108 = tpu.transpose %106, [1, 0] : vector<8x8xf32> -> vector<8x8xf32>
    %cst_40 = arith.constant dense<0.000000e+00> : vector<8x8xf32>
    %109 = tpu.matmul %105, %108, %cst_40 {dimension_numbers = #tpu.dot_dimension_numbers<[1], [0], [0], [1], [0, 0, 1, 1], [], []>} : vector<8x8xf32>, vector<8x8xf32>, vector<8x8xf32> -> vector<8x8xf32>
    %cst_41 = arith.constant 0.353553385 : f32
    %110 = vector.broadcast %cst_41 : f32 to vector<8x8xf32>
    %111 = arith.mulf %109, %110 : vector<8x8xf32>
    %112 = vector.broadcast %37 : vector<1x8xf32> to vector<8x8xf32>
    %113 = arith.addf %111, %112 : vector<8x8xf32>
    %cst_42 = arith.constant dense<0xFF800000> : vector<8xf32>
    %114 = vector.multi_reduction <maximumf>, %113, %cst_42 [1] : vector<8x8xf32> to vector<8xf32>
    %115 = vector.shape_cast %114 : vector<8xf32> to vector<8x1xf32>
    %116 = vector.broadcast %115 : vector<8x1xf32> to vector<8x8xf32>
    %117 = arith.subf %113, %116 : vector<8x8xf32>
    %118 = math.exp %117 : vector<8x8xf32>
    %cst_43 = arith.constant dense<0.000000e+00> : vector<8xf32>
    %119 = vector.multi_reduction <add>, %118, %cst_43 [1] : vector<8x8xf32> to vector<8xf32>
    %120 = vector.shape_cast %119 : vector<8xf32> to vector<8x1xf32>
    %121 = vector.broadcast %120 : vector<8x1xf32> to vector<8x8xf32>
    %122 = arith.divf %118, %121 : vector<8x8xf32>
    %cst_44 = arith.constant dense<0.000000e+00> : vector<8x8xf32>
    %123 = tpu.matmul %122, %107, %cst_44 {dimension_numbers = #tpu.dot_dimension_numbers<[1], [0], [0], [1], [0, 0, 1, 1], [], []>} : vector<8x8xf32>, vector<8x8xf32>, vector<8x8xf32> -> vector<8x8xf32>
    %124 = vector.extract_strided_slice %36 {offsets = [24, 0], sizes = [8, 32], strides = [1, 1]} : vector<32x32xf32> to vector<8x32xf32>
    %cst_45 = arith.constant dense<0.000000e+00> : vector<8x32xf32>
    %125 = tpu.matmul %123, %124, %cst_45 {dimension_numbers = #tpu.dot_dimension_numbers<[1], [0], [0], [1], [0, 0, 1, 1], [], []>} : vector<8x8xf32>, vector<8x32xf32>, vector<8x32xf32> -> vector<8x32xf32>
    %126 = arith.addf %104, %125 : vector<8x32xf32>
    %127 = vector.extract_strided_slice %35 {offsets = [1, 0], sizes = [1, 8], strides = [1, 1]} : vector<2x8xf32> to vector<1x8xf32>
    %cst_46 = arith.constant 0.000000e+00 : f32
    %128 = vector.broadcast %cst_46 : f32 to vector<8x32xf32>
    %129 = vector.extract_strided_slice %29 {offsets = [8, 0], sizes = [8, 8], strides = [1, 1]} : vector<16x96xf32> to vector<8x8xf32>
    %130 = vector.extract_strided_slice %29 {offsets = [8, 32], sizes = [8, 8], strides = [1, 1]} : vector<16x96xf32> to vector<8x8xf32>
    %131 = vector.extract_strided_slice %29 {offsets = [8, 64], sizes = [8, 8], strides = [1, 1]} : vector<16x96xf32> to vector<8x8xf32>
    %132 = tpu.transpose %130, [1, 0] : vector<8x8xf32> -> vector<8x8xf32>
    %cst_47 = arith.constant dense<0.000000e+00> : vector<8x8xf32>
    %133 = tpu.matmul %129, %132, %cst_47 {dimension_numbers = #tpu.dot_dimension_numbers<[1], [0], [0], [1], [0, 0, 1, 1], [], []>} : vector<8x8xf32>, vector<8x8xf32>, vector<8x8xf32> -> vector<8x8xf32>
    %cst_48 = arith.constant 0.353553385 : f32
    %134 = vector.broadcast %cst_48 : f32 to vector<8x8xf32>
    %135 = arith.mulf %133, %134 : vector<8x8xf32>
    %136 = vector.broadcast %127 : vector<1x8xf32> to vector<8x8xf32>
    %137 = arith.addf %135, %136 : vector<8x8xf32>
    %cst_49 = arith.constant dense<0xFF800000> : vector<8xf32>
    %138 = vector.multi_reduction <maximumf>, %137, %cst_49 [1] : vector<8x8xf32> to vector<8xf32>
    %139 = vector.shape_cast %138 : vector<8xf32> to vector<8x1xf32>
    %140 = vector.broadcast %139 : vector<8x1xf32> to vector<8x8xf32>
    %141 = arith.subf %137, %140 : vector<8x8xf32>
    %142 = math.exp %141 : vector<8x8xf32>
    %cst_50 = arith.constant dense<0.000000e+00> : vector<8xf32>
    %143 = vector.multi_reduction <add>, %142, %cst_50 [1] : vector<8x8xf32> to vector<8xf32>
    %144 = vector.shape_cast %143 : vector<8xf32> to vector<8x1xf32>
    %145 = vector.broadcast %144 : vector<8x1xf32> to vector<8x8xf32>
    %146 = arith.divf %142, %145 : vector<8x8xf32>
    %cst_51 = arith.constant dense<0.000000e+00> : vector<8x8xf32>
    %147 = tpu.matmul %146, %131, %cst_51 {dimension_numbers = #tpu.dot_dimension_numbers<[1], [0], [0], [1], [0, 0, 1, 1], [], []>} : vector<8x8xf32>, vector<8x8xf32>, vector<8x8xf32> -> vector<8x8xf32>
    %148 = vector.extract_strided_slice %36 {offsets = [0, 0], sizes = [8, 32], strides = [1, 1]} : vector<32x32xf32> to vector<8x32xf32>
    %cst_52 = arith.constant dense<0.000000e+00> : vector<8x32xf32>
    %149 = tpu.matmul %147, %148, %cst_52 {dimension_numbers = #tpu.dot_dimension_numbers<[1], [0], [0], [1], [0, 0, 1, 1], [], []>} : vector<8x8xf32>, vector<8x32xf32>, vector<8x32xf32> -> vector<8x32xf32>
    %150 = arith.addf %128, %149 : vector<8x32xf32>
    %151 = vector.extract_strided_slice %29 {offsets = [8, 8], sizes = [8, 8], strides = [1, 1]} : vector<16x96xf32> to vector<8x8xf32>
    %152 = vector.extract_strided_slice %29 {offsets = [8, 40], sizes = [8, 8], strides = [1, 1]} : vector<16x96xf32> to vector<8x8xf32>
    %153 = vector.extract_strided_slice %29 {offsets = [8, 72], sizes = [8, 8], strides = [1, 1]} : vector<16x96xf32> to vector<8x8xf32>
    %154 = tpu.transpose %152, [1, 0] : vector<8x8xf32> -> vector<8x8xf32>
    %cst_53 = arith.constant dense<0.000000e+00> : vector<8x8xf32>
    %155 = tpu.matmul %151, %154, %cst_53 {dimension_numbers = #tpu.dot_dimension_numbers<[1], [0], [0], [1], [0, 0, 1, 1], [], []>} : vector<8x8xf32>, vector<8x8xf32>, vector<8x8xf32> -> vector<8x8xf32>
    %cst_54 = arith.constant 0.353553385 : f32
    %156 = vector.broadcast %cst_54 : f32 to vector<8x8xf32>
    %157 = arith.mulf %155, %156 : vector<8x8xf32>
    %158 = vector.broadcast %127 : vector<1x8xf32> to vector<8x8xf32>
    %159 = arith.addf %157, %158 : vector<8x8xf32>
    %cst_55 = arith.constant dense<0xFF800000> : vector<8xf32>
    %160 = vector.multi_reduction <maximumf>, %159, %cst_55 [1] : vector<8x8xf32> to vector<8xf32>
    %161 = vector.shape_cast %160 : vector<8xf32> to vector<8x1xf32>
    %162 = vector.broadcast %161 : vector<8x1xf32> to vector<8x8xf32>
    %163 = arith.subf %159, %162 : vector<8x8xf32>
    %164 = math.exp %163 : vector<8x8xf32>
    %cst_56 = arith.constant dense<0.000000e+00> : vector<8xf32>
    %165 = vector.multi_reduction <add>, %164, %cst_56 [1] : vector<8x8xf32> to vector<8xf32>
    %166 = vector.shape_cast %165 : vector<8xf32> to vector<8x1xf32>
    %167 = vector.broadcast %166 : vector<8x1xf32> to vector<8x8xf32>
    %168 = arith.divf %164, %167 : vector<8x8xf32>
    %cst_57 = arith.constant dense<0.000000e+00> : vector<8x8xf32>
    %169 = tpu.matmul %168, %153, %cst_57 {dimension_numbers = #tpu.dot_dimension_numbers<[1], [0], [0], [1], [0, 0, 1, 1], [], []>} : vector<8x8xf32>, vector<8x8xf32>, vector<8x8xf32> -> vector<8x8xf32>
    %170 = vector.extract_strided_slice %36 {offsets = [8, 0], sizes = [8, 32], strides = [1, 1]} : vector<32x32xf32> to vector<8x32xf32>
    %cst_58 = arith.constant dense<0.000000e+00> : vector<8x32xf32>
    %171 = tpu.matmul %169, %170, %cst_58 {dimension_numbers = #tpu.dot_dimension_numbers<[1], [0], [0], [1], [0, 0, 1, 1], [], []>} : vector<8x8xf32>, vector<8x32xf32>, vector<8x32xf32> -> vector<8x32xf32>
    %172 = arith.addf %150, %171 : vector<8x32xf32>
    %173 = vector.extract_strided_slice %29 {offsets = [8, 16], sizes = [8, 8], strides = [1, 1]} : vector<16x96xf32> to vector<8x8xf32>
    %174 = vector.extract_strided_slice %29 {offsets = [8, 48], sizes = [8, 8], strides = [1, 1]} : vector<16x96xf32> to vector<8x8xf32>
    %175 = vector.extract_strided_slice %29 {offsets = [8, 80], sizes = [8, 8], strides = [1, 1]} : vector<16x96xf32> to vector<8x8xf32>
    %176 = tpu.transpose %174, [1, 0] : vector<8x8xf32> -> vector<8x8xf32>
    %cst_59 = arith.constant dense<0.000000e+00> : vector<8x8xf32>
    %177 = tpu.matmul %173, %176, %cst_59 {dimension_numbers = #tpu.dot_dimension_numbers<[1], [0], [0], [1], [0, 0, 1, 1], [], []>} : vector<8x8xf32>, vector<8x8xf32>, vector<8x8xf32> -> vector<8x8xf32>
    %cst_60 = arith.constant 0.353553385 : f32
    %178 = vector.broadcast %cst_60 : f32 to vector<8x8xf32>
    %179 = arith.mulf %177, %178 : vector<8x8xf32>
    %180 = vector.broadcast %127 : vector<1x8xf32> to vector<8x8xf32>
    %181 = arith.addf %179, %180 : vector<8x8xf32>
    %cst_61 = arith.constant dense<0xFF800000> : vector<8xf32>
    %182 = vector.multi_reduction <maximumf>, %181, %cst_61 [1] : vector<8x8xf32> to vector<8xf32>
    %183 = vector.shape_cast %182 : vector<8xf32> to vector<8x1xf32>
    %184 = vector.broadcast %183 : vector<8x1xf32> to vector<8x8xf32>
    %185 = arith.subf %181, %184 : vector<8x8xf32>
    %186 = math.exp %185 : vector<8x8xf32>
    %cst_62 = arith.constant dense<0.000000e+00> : vector<8xf32>
    %187 = vector.multi_reduction <add>, %186, %cst_62 [1] : vector<8x8xf32> to vector<8xf32>
    %188 = vector.shape_cast %187 : vector<8xf32> to vector<8x1xf32>
    %189 = vector.broadcast %188 : vector<8x1xf32> to vector<8x8xf32>
    %190 = arith.divf %186, %189 : vector<8x8xf32>
    %cst_63 = arith.constant dense<0.000000e+00> : vector<8x8xf32>
    %191 = tpu.matmul %190, %175, %cst_63 {dimension_numbers = #tpu.dot_dimension_numbers<[1], [0], [0], [1], [0, 0, 1, 1], [], []>} : vector<8x8xf32>, vector<8x8xf32>, vector<8x8xf32> -> vector<8x8xf32>
    %192 = vector.extract_strided_slice %36 {offsets = [16, 0], sizes = [8, 32], strides = [1, 1]} : vector<32x32xf32> to vector<8x32xf32>
    %cst_64 = arith.constant dense<0.000000e+00> : vector<8x32xf32>
    %193 = tpu.matmul %191, %192, %cst_64 {dimension_numbers = #tpu.dot_dimension_numbers<[1], [0], [0], [1], [0, 0, 1, 1], [], []>} : vector<8x8xf32>, vector<8x32xf32>, vector<8x32xf32> -> vector<8x32xf32>
    %194 = arith.addf %172, %193 : vector<8x32xf32>
    %195 = vector.extract_strided_slice %29 {offsets = [8, 24], sizes = [8, 8], strides = [1, 1]} : vector<16x96xf32> to vector<8x8xf32>
    %196 = vector.extract_strided_slice %29 {offsets = [8, 56], sizes = [8, 8], strides = [1, 1]} : vector<16x96xf32> to vector<8x8xf32>
    %197 = vector.extract_strided_slice %29 {offsets = [8, 88], sizes = [8, 8], strides = [1, 1]} : vector<16x96xf32> to vector<8x8xf32>
    %198 = tpu.transpose %196, [1, 0] : vector<8x8xf32> -> vector<8x8xf32>
    %cst_65 = arith.constant dense<0.000000e+00> : vector<8x8xf32>
    %199 = tpu.matmul %195, %198, %cst_65 {dimension_numbers = #tpu.dot_dimension_numbers<[1], [0], [0], [1], [0, 0, 1, 1], [], []>} : vector<8x8xf32>, vector<8x8xf32>, vector<8x8xf32> -> vector<8x8xf32>
    %cst_66 = arith.constant 0.353553385 : f32
    %200 = vector.broadcast %cst_66 : f32 to vector<8x8xf32>
    %201 = arith.mulf %199, %200 : vector<8x8xf32>
    %202 = vector.broadcast %127 : vector<1x8xf32> to vector<8x8xf32>
    %203 = arith.addf %201, %202 : vector<8x8xf32>
    %cst_67 = arith.constant dense<0xFF800000> : vector<8xf32>
    %204 = vector.multi_reduction <maximumf>, %203, %cst_67 [1] : vector<8x8xf32> to vector<8xf32>
    %205 = vector.shape_cast %204 : vector<8xf32> to vector<8x1xf32>
    %206 = vector.broadcast %205 : vector<8x1xf32> to vector<8x8xf32>
    %207 = arith.subf %203, %206 : vector<8x8xf32>
    %208 = math.exp %207 : vector<8x8xf32>
    %cst_68 = arith.constant dense<0.000000e+00> : vector<8xf32>
    %209 = vector.multi_reduction <add>, %208, %cst_68 [1] : vector<8x8xf32> to vector<8xf32>
    %210 = vector.shape_cast %209 : vector<8xf32> to vector<8x1xf32>
    %211 = vector.broadcast %210 : vector<8x1xf32> to vector<8x8xf32>
    %212 = arith.divf %208, %211 : vector<8x8xf32>
    %cst_69 = arith.constant dense<0.000000e+00> : vector<8x8xf32>
    %213 = tpu.matmul %212, %197, %cst_69 {dimension_numbers = #tpu.dot_dimension_numbers<[1], [0], [0], [1], [0, 0, 1, 1], [], []>} : vector<8x8xf32>, vector<8x8xf32>, vector<8x8xf32> -> vector<8x8xf32>
    %214 = vector.extract_strided_slice %36 {offsets = [24, 0], sizes = [8, 32], strides = [1, 1]} : vector<32x32xf32> to vector<8x32xf32>
    %cst_70 = arith.constant dense<0.000000e+00> : vector<8x32xf32>
    %215 = tpu.matmul %213, %214, %cst_70 {dimension_numbers = #tpu.dot_dimension_numbers<[1], [0], [0], [1], [0, 0, 1, 1], [], []>} : vector<8x8xf32>, vector<8x32xf32>, vector<8x32xf32> -> vector<8x32xf32>
    %216 = arith.addf %194, %215 : vector<8x32xf32>
    %217 = tpu.concatenate %126, %216 in 0 : vector<8x32xf32>, vector<8x32xf32> -> vector<16x32xf32>
    %218 = arith.addf %0, %217 : vector<16x32xf32>
    %c0_71 = arith.constant 0 : index
    %c0_72 = arith.constant 0 : index
    %219 = vector.load %arg7[%c0_71, %c0_72] : memref<1x32xf32, #tpu.memory_space<vmem>>, vector<1x32xf32>
    %220 = vector.broadcast %219 : vector<1x32xf32> to vector<16x32xf32>
    %221 = arith.addf %218, %220 : vector<16x32xf32>
    %c0_73 = arith.constant 0 : index
    %c0_74 = arith.constant 0 : index
    %222 = vector.load %arg8[%c0_73, %c0_74] : memref<1x32xf32, #tpu.memory_space<vmem>>, vector<1x32xf32>
    %c0_75 = arith.constant 0 : index
    %c0_76 = arith.constant 0 : index
    %223 = vector.load %arg9[%c0_75, %c0_76] : memref<1x32xf32, #tpu.memory_space<vmem>>, vector<1x32xf32>
    %cst_77 = arith.constant dense<0.000000e+00> : vector<16xf32>
    %224 = vector.multi_reduction <add>, %221, %cst_77 [1] : vector<16x32xf32> to vector<16xf32>
    %225 = vector.shape_cast %224 : vector<16xf32> to vector<16x1xf32>
    %cst_78 = arith.constant 3.200000e+01 : f32
    %226 = vector.broadcast %cst_78 : f32 to vector<16x1xf32>
    %227 = arith.divf %225, %226 : vector<16x1xf32>
    %228 = vector.broadcast %227 : vector<16x1xf32> to vector<16x32xf32>
    %229 = arith.subf %221, %228 : vector<16x32xf32>
    %230 = arith.mulf %229, %229 : vector<16x32xf32>
    %cst_79 = arith.constant dense<0.000000e+00> : vector<16xf32>
    %231 = vector.multi_reduction <add>, %230, %cst_79 [1] : vector<16x32xf32> to vector<16xf32>
    %232 = vector.shape_cast %231 : vector<16xf32> to vector<16x1xf32>
    %cst_80 = arith.constant 0.0322580636 : f32
    %233 = vector.broadcast %cst_80 : f32 to vector<16x1xf32>
    %234 = arith.mulf %232, %233 : vector<16x1xf32>
    %235 = math.sqrt %234 : vector<16x1xf32>
    %236 = vector.broadcast %227 : vector<16x1xf32> to vector<16x32xf32>
    %237 = arith.subf %221, %236 : vector<16x32xf32>
    %238 = vector.broadcast %222 : vector<1x32xf32> to vector<16x32xf32>
    %239 = arith.mulf %238, %237 : vector<16x32xf32>
    %cst_81 = arith.constant 9.99999997E-7 : f32
    %240 = vector.broadcast %cst_81 : f32 to vector<16x1xf32>
    %241 = arith.addf %235, %240 : vector<16x1xf32>
    %242 = vector.broadcast %241 : vector<16x1xf32> to vector<16x32xf32>
    %243 = arith.divf %239, %242 : vector<16x32xf32>
    %244 = vector.broadcast %223 : vector<1x32xf32> to vector<16x32xf32>
    %245 = arith.addf %243, %244 : vector<16x32xf32>
    %c0_82 = arith.constant 0 : index
    %c0_83 = arith.constant 0 : index
    %246 = vector.load %arg10[%c0_82, %c0_83] : memref<32x64xf32, #tpu.memory_space<vmem>>, vector<32x64xf32>
    %cst_84 = arith.constant dense<0.000000e+00> : vector<16x64xf32>
    %247 = tpu.matmul %245, %246, %cst_84 {dimension_numbers = #tpu.dot_dimension_numbers<[1], [0], [0], [1], [0, 0, 1, 1], [], []>} : vector<16x32xf32>, vector<32x64xf32>, vector<16x64xf32> -> vector<16x64xf32>
    %c0_85 = arith.constant 0 : index
    %c0_86 = arith.constant 0 : index
    %248 = vector.load %arg11[%c0_85, %c0_86] : memref<1x64xf32, #tpu.memory_space<vmem>>, vector<1x64xf32>
    %249 = vector.broadcast %248 : vector<1x64xf32> to vector<16x64xf32>
    %250 = arith.addf %247, %249 : vector<16x64xf32>
    %cst_87 = arith.constant 0.000000e+00 : f32
    %251 = vector.broadcast %cst_87 : f32 to vector<16x64xf32>
    %252 = arith.maximumf %250, %251 : vector<16x64xf32>
    %c0_88 = arith.constant 0 : index
    %c0_89 = arith.constant 0 : index
    %253 = vector.load %arg12[%c0_88, %c0_89] : memref<64x32xf32, #tpu.memory_space<vmem>>, vector<64x32xf32>
    %cst_90 = arith.constant dense<0.000000e+00> : vector<16x32xf32>
    %254 = tpu.matmul %252, %253, %cst_90 {dimension_numbers = #tpu.dot_dimension_numbers<[1], [0], [0], [1], [0, 0, 1, 1], [], []>} : vector<16x64xf32>, vector<64x32xf32>, vector<16x32xf32> -> vector<16x32xf32>
    %c0_91 = arith.constant 0 : index
    %c0_92 = arith.constant 0 : index
    %255 = vector.load %arg13[%c0_91, %c0_92] : memref<1x32xf32, #tpu.memory_space<vmem>>, vector<1x32xf32>
    %256 = vector.broadcast %255 : vector<1x32xf32> to vector<16x32xf32>
    %257 = arith.addf %254, %256 : vector<16x32xf32>
    %258 = arith.addf %221, %257 : vector<16x32xf32>
    %c0_93 = arith.constant 0 : index
    %c0_94 = arith.constant 0 : index
    %259 = vector.load %arg14[%c0_93, %c0_94] : memref<16x32xf32, #tpu.memory_space<vmem>>, vector<16x32xf32>
    tpu.vector_store %arg14[%c0_93, %c0_94], %258 {strides = array<i32>} : memref<16x32xf32, #tpu.memory_space<vmem>>, vector<16x32xf32>,
    return
  }
}

</mosaic_0001>

<bundles_post_ra>
// kernel: tpu_custom_call.1
= control target key start
LH: loop header
LB: loop body
LE: loop exit
PB: predicated region body
PF: predicated region fallthrough
CT: control target
= control target key end

     0   :  { %19 = vsyncpa [#allocation3], 0  ;;  %s3313_s0 = inlined_call_operand.hbm [shape: f32[16,32], index: 0, kind: input, shape index: {}]   ;;  %s3314_s1 = inlined_call_operand.vmem [shape: f32[2,8], index: 1, kind: input, shape index: {}]   ;;  %s3315_s2 = inlined_call_operand.vmem [shape: f32[1,32], index: 2, kind: input, shape index: {}]   ;;  %s3316_s3 = inlined_call_operand.vmem [shape: f32[1,32], index: 3, kind: input, shape index: {}]   ;;  %s3317_s4 = inlined_call_operand.vmem [shape: f32[32,96], index: 4, kind: input, shape index: {}]   ;;  %s3318_s5 = inlined_call_operand.vmem [shape: f32[1,96], index: 5, kind: input, shape index: {}]   ;;  %s3319_s6 = inlined_call_operand.vmem [shape: f32[32,32], index: 6, kind: input, shape index: {}]   ;;  %s3320_s7 = inlined_call_operand.vmem [shape: f32[1,32], index: 7, kind: input, shape index: {}]   ;;  %s3321_s8 = inlined_call_operand.vmem [shape: f32[1,32], index: 8, kind: input, shape index: {}]   ;;  %s3322_s9 = inlined_call_operand.vmem [shape: f32[1,32], index: 9, kind: input, shape index: {}]   ;;  %s3323_s10 = inlined_call_operand.vmem [shape: f32[32,64], index: 10, kind: input, shape index: {}]   ;;  %s3324_s11 = inlined_call_operand.vmem [shape: f32[1,64], index: 11, kind: input, shape index: {}]   ;;  %s3325_s12 = inlined_call_operand.vmem [shape: f32[64,32], index: 12, kind: input, shape index: {}]   ;;  %s3326_s13 = inlined_call_operand.vmem [shape: f32[1,32], index: 13, kind: input, shape index: {}]   ;;  %s3327_s14 = inlined_call_operand.hbm [shape: f32[16,32], index: 14, kind: output, shape index: {}]  }
   0x1   :  { %20 = vsyncpa [#allocation4], 0  ;;  %s2857_s29 = smov [#allocation2]   ;;  %s2809_s17 = scalar_lea.hbm %s3313_s0, 256 }
   0x2   :  { %s26_s30 = sshll.u32 %s2857_s29, 4  ;;  %p2810_p0 = scmp.ne.s32.totalorder %s3313_s0, %s2809_s17  ;;  %s27_s30 = int_to_ptr.vmem [resolvable:$true] %s26_s30 }
   0x3   :  { %p2813_p1 = scmp.lt.u32.totalorder %s2809_s17, %s3313_s0 }
   0x5   :  { %p2815_p2 = pnand %p2813_p1, %p2810_p0 }
   0x7   :  { %2818 = shalt.err (!%p2815_p2)
}
   0x8   :  { %s2819_s22 = scalar_lea.vmem %s27_s30, 256  ;;  %p2824_p4 = scmp.lt.s32.totalorder %s27_s30, %s27_s30 }
   0x9   :  { %p2820_p3 = scmp.ne.s32.totalorder %s27_s30, %s2819_s22  ;;  %p2825_p5 = scmp.lt.s32.totalorder %s2819_s22, %s2819_s22 }
   0xb   :  { %p2826_p6 = por %p2825_p5, %p2824_p4 }
   0xd   :  { %p2827_p7 = pnand %p2826_p6, %p2820_p3 }
   0xf   :  { %2830 = shalt.err (!%p2827_p7)
}
  0x10   :  { %s2858_s23 = smov 128   ;;  %s2859_s24 = smov 8  }
  0x11   :  { %32 = dma.hbm_to_vmem [thread:$0]  %s3313_s0, 256, %s27_s30, [#allocation3], %s2858_s23, %s2858_s23, %s2859_s24  }
  0x12   :  { %2853 = dma.done.wait [#allocation3], 256  }
  0x13   :  { %2854 = vsyncadd [#allocation3], 4294967040  ;;  %vm66_vm0 = vcmask 261120   ;;  %v2964_v0 = vld [vmem:[#allocation2] sm:$0xff]  ;;  %v2966_v1 = vld [vmem:[#allocation2 + $0x8] sm:$0xff]  ;;  %v2860_v46 = vmov 0.0   ;;  %v302_v55 = vlaneseq }
  0x14   :  { %v67_v2 = vsel %vm66_vm0, %v2964_v0, 0.0  ;;  %v70_v3 = vsel %vm66_vm0, %v2966_v1, 0.0  ;;  %v124_v14 = vld [vmem:[%s3317_s4] sm:$0xff]  ;;  %v125_v15 = vld [vmem:[%s3317_s4 + $0x8] sm:$0xff]  ;;  %v126_v16 = vld [vmem:[%s3317_s4 + $0x10] sm:$0xff]  ;;  %2567 = vmatprep.subr.mxu1 %v2860_v46  ;;  %vm2861_vm5 = vmmov 0  }
  0x15   :  { %68 = vadd.xlane.f32.xlu0 %v67_v2  ;;  %v2712_v17 = vpack.c.bf16 %v125_v15, %v124_v14  ;;  %v127_v18 = vld [vmem:[%s3317_s4 + $0x18] sm:$0xff]  ;;  %v2435_v36 = vld [vmem:[%s3315_s2] ss:$0 sm:$0xff]  ;;  %2569 = vmatprep.mubr.msk.f32.mxu1 %vm2861_vm5, %v2860_v46  ;;  %s2862_s21 = smov 88   ;;  %s2863_s22 = smov 96   ;;  %vm226_vm6 = vcmask 64512  }
  0x16   :  { %v2716_v19 = vpack.c.bf16 %v127_v18, %v126_v16  ;;  %v2436_v39 = vld [vmem:[%s3316_s3] ss:$0 sm:$0xff]  ;;  %s2864_s25 = smov 120   ;;  %v3029_v57 = vshrl.u32 %v302_v55, 7  ;;  %s2866_s0 = smov 80   ;;  %vm2332_vm12 = vcmask 523264  }
  0x17   :  { %2713 = vmatprep.subr.bf16.mxu0 %v2712_v17  ;;  %v2437_v47 = vld [vmem:[%s3318_s5] ss:$0 sm:$0xff]  ;;  %s2867_s27 = smov 112   ;;  %s2868_s28 = smov 56  }
  0x18   :  { %2715 = vmatpush3.bf16.msra.mxu0 %v2712_v17  ;;  %v216_v56 = vld [vmem:[%s3314_s1] sm:$0x3]  ;;  %v304_v58 = vsub.s32 0, %v3029_v57  ;;  %s2865_s1 = smov 64   ;;  %s2869_s17 = smov 72  }
  0x19   :  { %71 = vadd.xlane.f32.xlu0 %v70_v3  ;;  %2717 = vmatprep.subr.bf16.mxu0 %v2716_v19  ;;  %vm217_vm7 = vcmp.eq.f32.partialorder %v216_v56, 0.0  ;;  %s2870_s4 = smov 104   ;;  %s2871_s18 = smov 48  }
  0x1a   :  { %v3033_v59 = vsel %vm217_vm7, -1e+09, %v2860_v46  ;;  %s2872_s2 = smov 40  }
  0x1b   :  { %v3036_v60 = vrot.slane %v3033_v59, %v304_v58 }
  0x1c   :  { %2719 = vmatpush3.bf16.msra.mxu0 %v2716_v19 }
  0x1d   :  { %2562 = vmatprep.subr.mxu0 %v2860_v46 }
  0xa2   :  { %v69_v4 = vpop.xlane.xlu0 %68 }
  0xa3   :  { %v74_v5 = vmul.f32 0.03125, %v69_v4 }
  0xa5   :  { %v76_v6 = vsub.f32 %v2964_v0, %v74_v5 }
  0xa6   :  { %v72_v7 = vpop.xlane.xlu0 %71 }
  0xa7   :  { %v75_v8 = vmul.f32 0.03125, %v72_v7  ;;  %v78_v9 = vmul.f32 %v76_v6, %v76_v6  ;;  %v108_v37 = vmul.f32 %v2435_v36, %v76_v6 }
  0xa9   :  { %v77_v10 = vsub.f32 %v2966_v1, %v75_v8  ;;  %v80_v11 = vsel %vm66_vm0, %v78_v9, 0.0 }
  0xaa   :  { %81 = vadd.xlane.f32.xlu1 %v80_v11 }
  0xab   :  { %v79_v12 = vmul.f32 %v77_v10, %v77_v10  ;;  %v109_v41 = vmul.f32 %v2435_v36, %v77_v10 }
  0xad   :  { %v83_v13 = vsel %vm66_vm0, %v79_v12, 0.0 }
  0xae   :  { %84 = vadd.xlane.f32.xlu1 %v83_v13 }
 0x137   :  { %v82_v20 = vpop.xlane.xlu1 %81 }
 0x138   :  { %v86_v21 = vmul.f32 0.032258064, %v82_v20  ;;  %v3056_v20 = vld [vmem:[%s3319_s6 + $0x8] sm:$0xff] }
 0x13a   :  { %2761 = vrsqrt.f32 %v86_v21  ;;  %vm90_vm1 = vcmp.eq.f32.partialorder %v86_v21, inf  ;;  %v93_v26 = vand.u32 2147483648, %v86_v21  ;;  %vm92_vm2 = vcmp.eq.f32.partialorder %v86_v21, 0.0 }
 0x13b   :  { %v85_v22 = vpop.xlane.xlu1 %84 }
 0x13c   :  { %v87_v23 = vmul.f32 0.032258064, %v85_v22 }
 0x13e   :  { %2763 = vrsqrt.f32 %v87_v23  ;;  %vm97_vm3 = vcmp.eq.f32.partialorder %v87_v23, inf  ;;  %v100_v32 = vand.u32 2147483648, %v87_v23  ;;  %vm99_vm4 = vcmp.eq.f32.partialorder %v87_v23, 0.0 }
 0x144   :  { %v2762_v24 = vpop.eup %2761 }
 0x145   :  { %v89_v25 = vmul.f32 %v2762_v24, %v86_v21 }
 0x147   :  { %v91_v27 = vsel %vm90_vm1, %v86_v21, %v89_v25 }
 0x148   :  { %v2764_v28 = vpop.eup %2763  ;;  %v94_v29 = vsel %vm92_vm2, %v93_v26, %v91_v27 }
 0x149   :  { %v96_v30 = vmul.f32 %v2764_v28, %v87_v23  ;;  %v110_v31 = vadd.f32 1e-06, %v94_v29  ;;  %v3070_v28 = vld [vmem:[%s3319_s6] sm:$0xff] }
 0x14b   :  { %v98_v33 = vsel %vm97_vm3, %v87_v23, %v96_v30  ;;  %2765 = vrcp.f32 %v110_v31 }
 0x14c   :  { %v101_v34 = vsel %vm99_vm4, %v100_v32, %v98_v33 }
 0x14d   :  { %v111_v35 = vadd.f32 1e-06, %v101_v34 }
 0x14f   :  { %2767 = vrcp.f32 %v111_v35 }
 0x155   :  { %v2766_v38 = vpop.eup %2765 }
 0x156   :  { %v113_v40 = vmul.f32 %v2766_v38, %v108_v37 }
 0x158   :  { %v122_v42 = vadd.f32 %v2436_v39, %v113_v40 }
 0x159   :  { %v2768_v43 = vpop.eup %2767 }
 0x15a   :  { %v115_v44 = vmul.f32 %v2768_v43, %v109_v41  ;;  %2559 = vmatprep.mubr.msk.f32.mxu0 %vm66_vm0, %v122_v42 }
 0x15c   :  { %v123_v45 = vadd.f32 %v2436_v39, %v115_v44 }
 0x15e   :  { %2560 = vmatmul.mubr.msk.f32.vlgmr.msra.gmra.mrb[0].mxu0 %vm66_vm0, %v123_v45 }
 0x15f   :  { %2564 = vmatprep.mubr.msk.f32.mxu0 %vm2861_vm5, %v2860_v46 }
 0x231   :  { %v2561_v48 = vpop.f32.mrb[0].mxu0 }
 0x232   :  { %v3005_v49 = vadd.f32 %v2561_v48, %v2437_v47  ;;  %v207_v50 = vpop.f32.mrb[1].mxu0 }
 0x233   :  { %v3007_v51 = vadd.f32 %v2437_v47, %v207_v50 }
 0x235   :  { %396 = vrot.lane.b32.xlu1 %v3007_v51, %s2862_s21  ;;  %224 = vrot.lane.b32.xlu0 %v3007_v51, %s2863_s22 }
 0x239   :  { %394 = vrot.lane.b32.xlu1 %v3007_v51, %s2864_s25 }
 0x2a7   :  { %v225_v52 = vpop.permute.xlu0 %224  ;;  %v397_v53 = vpop.permute.xlu1 %396 }
 0x2a8   :  { %2563 = vmatpush3.xpose.msk.msra.mxu0 %vm226_vm6, %v225_v52 }
 0x2a9   :  { %2572 = vmatprep.subr.mxu0 %v2860_v46 }
 0x2ab   :  { %2565 = vmatmul.mubr.msk.f32.vlgmr.msra.gmra.mrb[2].mxu0 %vm226_vm6, %v3007_v51  ;;  %v395_v54 = vpop.permute.xlu1 %394 }
 0x2ac   :  { %2573 = vmatpush3.xpose.msk.msra.mxu0 %vm226_vm6, %v397_v53  ;;  %2574 = vmatprep.mubr.msk.f32.mxu0 %vm2861_vm5, %v2860_v46 }
 0x2ad   :  { %2582 = vmatprep.subr.mxu0 %v2860_v46 }
 0x2af   :  { %2575 = vmatmul.mubr.msk.f32.vlgmr.msra.gmra.mrb[4].mxu0 %vm226_vm6, %v395_v54 }
 0x2b0   :  { %2584 = vmatprep.mubr.msk.f32.mxu0 %vm2861_vm5, %v2860_v46  ;;  %2583 = vmatpush3.msra.mxu0 %v3056_v20 }
 0x2b1   :  { %2592 = vmatprep.subr.mxu0 %v2860_v46 }
 0x37e   :  { %v297_v61 = vpop.f32.mrb[2].mxu0 }
 0x37f   :  { %v301_v62 = vmul.f32 0.35355338, %v297_v61  ;;  %v2566_v63 = vpop.f32.mrb[3].mxu0 }
 0x381   :  { %v306_v2 = vadd.f32 %v3036_v60, %v301_v62  ;;  %v3110_v62 = vld [vmem:[%s3319_s6 + $0x10] sm:$0xff] }
 0x382   :  { %v468_v3 = vpop.f32.mrb[4].mxu0 }
 0x383   :  { %v472_v4 = vmul.f32 0.35355338, %v468_v3  ;;  %v2576_v5 = vpop.f32.mrb[5].mxu0  ;;  %v307_v6 = vsel %vm226_vm6, %v306_v2, -inf }
 0x384   :  { %308 = vmax.xlane.f32.xlu1 %v307_v6 }
 0x385   :  { %v473_v7 = vadd.f32 %v472_v4, %v3036_v60 }
 0x387   :  { %v474_v8 = vsel %vm226_vm6, %v473_v7, -inf }
 0x388   :  { %475 = vmax.xlane.f32.xlu0 %v474_v8 }
 0x395   :  { %318 = vrot.lane.b32.xlu1 %v3007_v51, %s2865_s1 }
 0x399   :  { %709 = vrot.lane.b32.xlu1 %v3007_v51, %s2866_s0 }
 0x39d   :  { %707 = vrot.lane.b32.xlu1 %v3007_v51, %s2867_s27 }
 0x411   :  { %v309_v9 = vpop.xlane.xlu1 %308 }
 0x412   :  { %v310_v10 = vsub.f32 %v306_v2, %v309_v9 }
 0x414   :  { %v311_v11 = vmul.f32 1.442695, %v310_v10 }
 0x415   :  { %v319_v12 = vpop.permute.xlu1 %318  ;;  %v476_v13 = vpop.xlane.xlu0 %475 }
 0x416   :  { %2769 = vpow2.f32 %v311_v11  ;;  %v477_v14 = vsub.f32 %v473_v7, %v476_v13  ;;  %2568 = vmatpush3.msra.mxu1 %v319_v12 }
 0x417   :  { %2577 = vmatprep.subr.mxu1 %v2860_v46 }
 0x418   :  { %v478_v15 = vmul.f32 1.442695, %v477_v14 }
 0x419   :  { %v710_v31 = vpop.permute.xlu1 %709 }
 0x41a   :  { %2771 = vpow2.f32 %v478_v15 }
 0x41d   :  { %v708_v34 = vpop.permute.xlu1 %707 }
 0x420   :  { %v2770_v16 = vpop.eup %2769 }
 0x421   :  { %v313_v17 = vsel %vm226_vm6, %v2770_v16, 0.0 }
 0x422   :  { %314 = vadd.xlane.f32.xlu0 %v313_v17 }
 0x424   :  { %v2772_v18 = vpop.eup %2771 }
 0x425   :  { %v480_v19 = vsel %vm226_vm6, %v2772_v18, 0.0 }
 0x426   :  { %481 = vadd.xlane.f32.xlu0 %v480_v19 }
 0x43c   :  { %485 = vrot.lane.b32.xlu0 %v3007_v51, %s2868_s28 }
 0x4af   :  { %v315_v21 = vpop.xlane.xlu0 %314 }
 0x4b0   :  { %2773 = vrcp.f32 %v315_v21 }
 0x4b3   :  { %v482_v22 = vpop.xlane.xlu0 %481 }
 0x4b4   :  { %2775 = vrcp.f32 %v482_v22  ;;  %v3147_v22 = vld [vmem:[%s3319_s6 + $0x18] sm:$0xff] }
 0x4b7   :  { %v486_v25 = vpop.permute.xlu0 %485 }
 0x4ba   :  { %v2774_v23 = vpop.eup %2773 }
 0x4bb   :  { %v317_v24 = vmul.f32 %v2774_v23, %v2770_v16  ;;  %v1269_v23 = vsub.s32 1, %v3029_v57 }
 0x4bd   :  { %2570 = vmatmul.mubr.msk.f32.vlgmr.msra.gmra.mrb[0].mxu1 %vm226_vm6, %v317_v24 }
 0x4be   :  { %v2776_v26 = vpop.eup %2775  ;;  %2578 = vmatpush3.msra.mxu1 %v486_v25  ;;  %2579 = vmatprep.mubr.msk.f32.mxu1 %vm2861_vm5, %v2860_v46 }
 0x4bf   :  { %v484_v27 = vmul.f32 %v2776_v26, %v2772_v18  ;;  %2587 = vmatprep.subr.mxu1 %v2860_v46 }
 0x4c1   :  { %2580 = vmatmul.mubr.msk.f32.vlgmr.msra.gmra.mrb[2].mxu1 %vm226_vm6, %v484_v27 }
 0x4c2   :  { %2589 = vmatprep.mubr.msk.f32.mxu1 %vm2861_vm5, %v2860_v46  ;;  %2588 = vmatpush3.msra.mxu1 %v3070_v28 }
 0x4c3   :  { %2597 = vmatprep.subr.mxu1 %v2860_v46 }
 0x590   :  { %v390_v29 = vpop.f32.mrb[0].mxu1 }
 0x591   :  { %v2571_v30 = vpop.f32.mrb[1].mxu1  ;;  %2590 = vmatmul.mubr.msk.f32.vlgmr.msra.gmra.mrb[4].mxu1 %vm226_vm6, %v390_v29 }
 0x592   :  { %2599 = vmatprep.mubr.msk.f32.mxu1 %vm2861_vm5, %v2860_v46 }
 0x594   :  { %v557_v32 = vpop.f32.mrb[2].mxu1 }
 0x595   :  { %v2581_v33 = vpop.f32.mrb[3].mxu1  ;;  %2585 = vmatmul.mubr.msk.f32.vlgmr.msra.gmra.mrb[6].mxu0 %vm226_vm6, %v557_v32 }
 0x596   :  { %2593 = vmatpush3.xpose.msk.msra.mxu0 %vm226_vm6, %v710_v31  ;;  %2594 = vmatprep.mubr.msk.f32.mxu0 %vm2861_vm5, %v2860_v46 }
 0x597   :  { %2602 = vmatprep.subr.mxu0 %v2860_v46 }
 0x599   :  { %2595 = vmatmul.mubr.msk.f32.vlgmr.msra.gmra.mrb[8].mxu0 %vm226_vm6, %v708_v34 }
 0x59a   :  { %2604 = vmatprep.mubr.msk.f32.mxu0 %vm2861_vm5, %v2860_v46  ;;  %2603 = vmatpush3.msra.mxu0 %v3110_v62 }
 0x59b   :  { %2612 = vmatprep.subr.mxu0 %v2860_v46 }
 0x664   :  { %v703_v35 = vpop.f32.mrb[4].mxu1 }
 0x665   :  { %v2591_v36 = vpop.f32.mrb[5].mxu1 }
 0x668   :  { %v630_v37 = vpop.f32.mrb[6].mxu0 }
 0x669   :  { %v3085_v38 = vadd.f32 %v703_v35, %v630_v37  ;;  %v2586_v39 = vpop.f32.mrb[7].mxu0 }
 0x66c   :  { %v781_v40 = vpop.f32.mrb[8].mxu0 }
 0x66d   :  { %v785_v41 = vmul.f32 0.35355338, %v781_v40  ;;  %v2596_v42 = vpop.f32.mrb[9].mxu0 }
 0x66f   :  { %v786_v43 = vadd.f32 %v785_v41, %v3036_v60 }
 0x671   :  { %v787_v44 = vsel %vm226_vm6, %v786_v43, -inf }
 0x672   :  { %788 = vmax.xlane.f32.xlu1 %v787_v44 }
 0x683   :  { %950 = vrot.lane.b32.xlu1 %v3007_v51, %s2869_s17 }
 0x687   :  { %948 = vrot.lane.b32.xlu1 %v3007_v51, %s2870_s4 }
 0x68b   :  { %1190 = vrot.lane.b32.xlu1 %v3005_v49, %s2863_s22 }
 0x6ff   :  { %v789_v45 = vpop.xlane.xlu1 %788 }
 0x700   :  { %v790_v47 = vsub.f32 %v786_v43, %v789_v45 }
 0x702   :  { %v791_v48 = vmul.f32 1.442695, %v790_v47 }
 0x703   :  { %v951_v56 = vpop.permute.xlu1 %950 }
 0x704   :  { %2777 = vpow2.f32 %v791_v48 }
 0x707   :  { %v949_v61 = vpop.permute.xlu1 %948 }
 0x70b   :  { %v1191_v15 = vpop.permute.xlu1 %1190 }
 0x70e   :  { %v2778_v50 = vpop.eup %2777 }
 0x70f   :  { %v793_v52 = vsel %vm226_vm6, %v2778_v50, 0.0 }
 0x710   :  { %794 = vadd.xlane.f32.xlu0 %v793_v52 }
 0x726   :  { %798 = vrot.lane.b32.xlu0 %v3007_v51, %s2871_s18 }
 0x79d   :  { %v795_v53 = vpop.xlane.xlu0 %794 }
 0x79e   :  { %2779 = vrcp.f32 %v795_v53 }
 0x7a1   :  { %v799_v54 = vpop.permute.xlu0 %798 }
 0x7a2   :  { %2598 = vmatpush3.msra.mxu1 %v799_v54 }
 0x7a3   :  { %2607 = vmatprep.subr.mxu1 %v2860_v46 }
 0x7a8   :  { %v2780_v55 = vpop.eup %2779 }
 0x7a9   :  { %v797_v58 = vmul.f32 %v2780_v55, %v2778_v50 }
 0x7ab   :  { %2600 = vmatmul.mubr.msk.f32.vlgmr.msra.gmra.mrb[6].mxu1 %vm226_vm6, %v797_v58 }
 0x7ac   :  { %2608 = vmatpush3.xpose.msk.msra.mxu1 %vm226_vm6, %v951_v56  ;;  %2609 = vmatprep.mubr.msk.f32.mxu1 %vm2861_vm5, %v2860_v46 }
 0x7ad   :  { %2617 = vmatprep.subr.mxu1 %v2860_v46 }
 0x7af   :  { %2610 = vmatmul.mubr.msk.f32.vlgmr.msra.gmra.mrb[8].mxu1 %vm226_vm6, %v949_v61 }
 0x7b0   :  { %2619 = vmatprep.mubr.msk.f32.mxu1 %vm2861_vm5, %v2860_v46  ;;  %2618 = vmatpush3.msra.mxu1 %v3147_v22 }
 0x7b1   :  { %2627 = vmatprep.subr.mxu1 %v2860_v46 }
 0x87e   :  { %v870_v63 = vpop.f32.mrb[6].mxu1 }
 0x87f   :  { %v2601_v2 = vpop.f32.mrb[7].mxu1  ;;  %2605 = vmatmul.mubr.msk.f32.vlgmr.msra.gmra.mrb[10].mxu0 %vm226_vm6, %v870_v63 }
 0x880   :  { %2614 = vmatprep.mubr.msk.f32.mxu0 %vm2861_vm5, %v2860_v46 }
 0x882   :  { %v1022_v3 = vpop.f32.mrb[8].mxu1 }
 0x883   :  { %v1026_v4 = vmul.f32 0.35355338, %v1022_v3  ;;  %v2611_v5 = vpop.f32.mrb[9].mxu1 }
 0x885   :  { %v1027_v6 = vadd.f32 %v1026_v4, %v3036_v60 }
 0x887   :  { %v1028_v7 = vsel %vm226_vm6, %v1027_v6, -inf }
 0x888   :  { %1029 = vmax.xlane.f32.xlu0 %v1028_v7 }
 0x89e   :  { %1039 = vrot.lane.b32.xlu0 %v3007_v51, %s2872_s2 }
 0x8a2   :  { %1361 = vrot.lane.b32.xlu0 %v3005_v49, %s2862_s21 }
 0x915   :  { %v1030_v8 = vpop.xlane.xlu0 %1029 }
 0x916   :  { %v1031_v9 = vsub.f32 %v1027_v6, %v1030_v8 }
 0x918   :  { %v1032_v10 = vmul.f32 1.442695, %v1031_v9 }
 0x919   :  { %v1040_v11 = vpop.permute.xlu0 %1039 }
 0x91a   :  { %2781 = vpow2.f32 %v1032_v10  ;;  %2613 = vmatpush3.msra.mxu0 %v1040_v11 }
 0x91b   :  { %2622 = vmatprep.subr.mxu0 %v2860_v46 }
 0x91d   :  { %v1362_v19 = vpop.permute.xlu0 %1361 }
 0x924   :  { %v2782_v12 = vpop.eup %2781 }
 0x925   :  { %v1034_v60 = vsel %vm226_vm6, %v2782_v12, 0.0 }
 0x926   :  { %1035 = vadd.xlane.f32.xlu1 %v1034_v60 }
 0x937   :  { %1359 = vrot.lane.b32.xlu1 %v3005_v49, %s2864_s25 }
 0x952   :  { %v943_v13 = vpop.f32.mrb[10].mxu0 }
 0x953   :  { %v947_v51 = vadd.f32 %v943_v13, %v3085_v38  ;;  %v2606_v14 = vpop.f32.mrb[11].mxu0 }
 0x9b3   :  { %v1036_v16 = vpop.xlane.xlu1 %1035 }
 0x9b4   :  { %2783 = vrcp.f32 %v1036_v16 }
 0x9b7   :  { %v1360_v21 = vpop.permute.xlu1 %1359 }
 0x9be   :  { %v2784_v17 = vpop.eup %2783 }
 0x9bf   :  { %v1038_v18 = vmul.f32 %v2784_v17, %v2782_v12 }
 0x9c1   :  { %2615 = vmatmul.mubr.msk.f32.vlgmr.msra.gmra.mrb[12].mxu0 %vm226_vm6, %v1038_v18 }
 0x9c2   :  { %2623 = vmatpush3.xpose.msk.msra.mxu0 %vm226_vm6, %v1191_v15  ;;  %2624 = vmatprep.mubr.msk.f32.mxu0 %vm2861_vm5, %v2860_v46 }
 0x9c3   :  { %2632 = vmatprep.subr.mxu0 %v2860_v46 }
 0x9c5   :  { %2625 = vmatmul.mubr.msk.f32.vlgmr.msra.gmra.mrb[14].mxu0 %vm226_vm6, %v3005_v49 }
 0x9c6   :  { %2633 = vmatpush3.xpose.msk.msra.mxu0 %vm226_vm6, %v1362_v19  ;;  %2634 = vmatprep.mubr.msk.f32.mxu0 %vm2861_vm5, %v2860_v46 }
 0x9c7   :  { %2642 = vmatprep.subr.mxu0 %v2860_v46 }
 0x9c9   :  { %2635 = vmatmul.mubr.msk.f32.vlgmr.msra.gmra.mrb[16].mxu0 %vm226_vm6, %v1360_v21 }
 0x9ca   :  { %2643 = vmatpush3.msra.mxu0 %v3056_v20  ;;  %2644 = vmatprep.mubr.msk.f32.mxu0 %vm2861_vm5, %v2860_v46  ;;  %v3156_v20 = vrot.slane %v3033_v59, %v1269_v23 }
 0x9cb   :  { %2652 = vmatprep.subr.mxu0 %v2860_v46 }
 0xa94   :  { %v1111_v24 = vpop.f32.mrb[12].mxu0 }
 0xa95   :  { %v2616_v25 = vpop.f32.mrb[13].mxu0  ;;  %2620 = vmatmul.mubr.msk.f32.vlgmr.msra.gmra.mrb[10].mxu1 %vm226_vm6, %v1111_v24 }
 0xa96   :  { %2629 = vmatprep.mubr.msk.f32.mxu1 %vm2861_vm5, %v2860_v46 }
 0xa98   :  { %v1262_v26 = vpop.f32.mrb[14].mxu0 }
 0xa99   :  { %v1266_v27 = vmul.f32 0.35355338, %v1262_v26  ;;  %v2626_v29 = vpop.f32.mrb[15].mxu0 }
 0xa9b   :  { %v1271_v30 = vadd.f32 %v3156_v20, %v1266_v27 }
 0xa9c   :  { %v1433_v31 = vpop.f32.mrb[16].mxu0 }
 0xa9d   :  { %v1437_v32 = vmul.f32 0.35355338, %v1433_v31  ;;  %v2636_v33 = vpop.f32.mrb[17].mxu0  ;;  %v1272_v57 = vsel %vm226_vm6, %v1271_v30, -inf }
 0xa9e   :  { %1273 = vmax.xlane.f32.xlu0 %v1272_v57 }
 0xa9f   :  { %v1438_v34 = vadd.f32 %v1437_v32, %v3156_v20 }
 0xaa1   :  { %v1439_v35 = vsel %vm226_vm6, %v1438_v34, -inf }
 0xaa2   :  { %1440 = vmax.xlane.f32.xlu1 %v1439_v35 }
 0xab3   :  { %1450 = vrot.lane.b32.xlu1 %v3005_v49, %s2868_s28 }
 0xab7   :  { %1674 = vrot.lane.b32.xlu1 %v3005_v49, %s2866_s0 }
 0xabb   :  { %1672 = vrot.lane.b32.xlu1 %v3005_v49, %s2867_s27 }
 0xb2b   :  { %v1274_v59 = vpop.xlane.xlu0 %1273 }
 0xb2c   :  { %v1275_v36 = vsub.f32 %v1271_v30, %v1274_v59 }
 0xb2e   :  { %v1276_v37 = vmul.f32 1.442695, %v1275_v36 }
 0xb2f   :  { %v1441_v38 = vpop.xlane.xlu1 %1440 }
 0xb30   :  { %2785 = vpow2.f32 %v1276_v37  ;;  %v1442_v39 = vsub.f32 %v1438_v34, %v1441_v38 }
 0xb32   :  { %v1443_v40 = vmul.f32 1.442695, %v1442_v39 }
 0xb33   :  { %v1451_v56 = vpop.permute.xlu1 %1450 }
 0xb34   :  { %2787 = vpow2.f32 %v1443_v40 }
 0xb37   :  { %v1675_v3 = vpop.permute.xlu1 %1674 }
 0xb3a   :  { %v2786_v41 = vpop.eup %2785 }
 0xb3b   :  { %v1278_v42 = vsel %vm226_vm6, %v2786_v41, 0.0 }
 0xb3c   :  { %1279 = vadd.xlane.f32.xlu0 %v1278_v42 }
 0xb3e   :  { %v2788_v43 = vpop.eup %2787 }
 0xb3f   :  { %v1445_v44 = vsel %vm226_vm6, %v2788_v43, 0.0 }
 0xb40   :  { %1446 = vadd.xlane.f32.xlu0 %v1445_v44 }
 0xb56   :  { %1283 = vrot.lane.b32.xlu0 %v3005_v49, %s2865_s1 }
 0xb68   :  { %v1184_v45 = vpop.f32.mrb[10].mxu1 }
 0xb69   :  { %v3172_v47 = vadd.f32 %v1184_v45, %v947_v51  ;;  %v2621_v48 = vpop.f32.mrb[11].mxu1 }
 0xb6b   :  { %v2154_v30 = vadd.f32 %v3172_v47, %v2964_v0 }
 0xbc9   :  { %v1280_v50 = vpop.xlane.xlu0 %1279 }
 0xbca   :  { %2789 = vrcp.f32 %v1280_v50 }
 0xbcd   :  { %v1447_v52 = vpop.xlane.xlu0 %1446 }
 0xbce   :  { %2791 = vrcp.f32 %v1447_v52 }
 0xbd1   :  { %v1284_v53 = vpop.permute.xlu0 %1283 }
 0xbd2   :  { %2628 = vmatpush3.msra.mxu1 %v1284_v53 }
 0xbd3   :  { %2637 = vmatprep.subr.mxu1 %v2860_v46 }
 0xbd4   :  { %v2790_v54 = vpop.eup %2789 }
 0xbd5   :  { %v1282_v55 = vmul.f32 %v2790_v54, %v2786_v41 }
 0xbd7   :  { %2630 = vmatmul.mubr.msk.f32.vlgmr.msra.gmra.mrb[12].mxu1 %vm226_vm6, %v1282_v55 }
 0xbd8   :  { %v2792_v58 = vpop.eup %2791  ;;  %2638 = vmatpush3.msra.mxu1 %v1451_v56  ;;  %2639 = vmatprep.mubr.msk.f32.mxu1 %vm2861_vm5, %v2860_v46 }
 0xbd9   :  { %v1449_v61 = vmul.f32 %v2792_v58, %v2788_v43  ;;  %2647 = vmatprep.subr.mxu1 %v2860_v46 }
 0xbdb   :  { %2640 = vmatmul.mubr.msk.f32.vlgmr.msra.gmra.mrb[14].mxu1 %vm226_vm6, %v1449_v61 }
 0xbdc   :  { %2648 = vmatpush3.msra.mxu1 %v3070_v28  ;;  %2649 = vmatprep.mubr.msk.f32.mxu1 %vm2861_vm5, %v2860_v46  ;;  %v1673_v28 = vpop.permute.xlu1 %1672 }
 0xbdd   :  { %2657 = vmatprep.subr.mxu1 %v2860_v46 }
 0xcaa   :  { %v1355_v63 = vpop.f32.mrb[12].mxu1 }
 0xcab   :  { %v2631_v2 = vpop.f32.mrb[13].mxu1  ;;  %2650 = vmatmul.mubr.msk.f32.vlgmr.msra.gmra.mrb[16].mxu1 %vm226_vm6, %v1355_v63 }
 0xcac   :  { %2659 = vmatprep.mubr.msk.f32.mxu1 %vm2861_vm5, %v2860_v46 }
 0xcae   :  { %v1522_v4 = vpop.f32.mrb[14].mxu1 }
 0xcaf   :  { %v2641_v5 = vpop.f32.mrb[15].mxu1  ;;  %2645 = vmatmul.mubr.msk.f32.vlgmr.msra.gmra.mrb[18].mxu0 %vm226_vm6, %v1522_v4 }
 0xcb0   :  { %2653 = vmatpush3.xpose.msk.msra.mxu0 %vm226_vm6, %v1675_v3  ;;  %2654 = vmatprep.mubr.msk.f32.mxu0 %vm2861_vm5, %v2860_v46 }
 0xcb1   :  { %2662 = vmatprep.subr.mxu0 %v2860_v46 }
 0xcb3   :  { %2655 = vmatmul.mubr.msk.f32.vlgmr.msra.gmra.mrb[20].mxu0 %vm226_vm6, %v1673_v28 }
 0xcb4   :  { %2663 = vmatpush3.msra.mxu0 %v3110_v62  ;;  %2664 = vmatprep.mubr.msk.f32.mxu0 %vm2861_vm5, %v2860_v46 }
 0xcb5   :  { %2672 = vmatprep.subr.mxu0 %v2860_v46 }
 0xd7e   :  { %v1668_v6 = vpop.f32.mrb[16].mxu1 }
 0xd7f   :  { %v2651_v7 = vpop.f32.mrb[17].mxu1 }
 0xd82   :  { %v1595_v8 = vpop.f32.mrb[18].mxu0 }
 0xd83   :  { %v1669_v9 = vadd.f32 %v1668_v6, %v1595_v8  ;;  %v2646_v10 = vpop.f32.mrb[19].mxu0 }
 0xd86   :  { %v1746_v11 = vpop.f32.mrb[20].mxu0 }
 0xd87   :  { %v1750_v12 = vmul.f32 0.35355338, %v1746_v11  ;;  %v2656_v60 = vpop.f32.mrb[21].mxu0 }
 0xd89   :  { %v1751_v13 = vadd.f32 %v1750_v12, %v3156_v20  ;;  %v2473_v12 = vld [vmem:[%s3321_s8] ss:$0 sm:$0xff] }
 0xd8b   :  { %v1752_v51 = vsel %vm226_vm6, %v1751_v13, -inf }
 0xd8c   :  { %1753 = vmax.xlane.f32.xlu0 %v1752_v51  ;;  %v2474_v51 = vld [vmem:[%s3322_s9] ss:$0 sm:$0xff] }
 0xda2   :  { %1763 = vrot.lane.b32.xlu0 %v3005_v49, %s2871_s18 }
 0xda6   :  { %1913 = vrot.lane.b32.xlu0 %v3005_v49, %s2870_s4 }
 0xe19   :  { %v1754_v62 = vpop.xlane.xlu0 %1753 }
 0xe1a   :  { %v1755_v14 = vsub.f32 %v1751_v13, %v1754_v62 }
 0xe1c   :  { %v1756_v15 = vmul.f32 1.442695, %v1755_v14 }
 0xe1d   :  { %v1764_v16 = vpop.permute.xlu0 %1763 }
 0xe1e   :  { %2793 = vpow2.f32 %v1756_v15  ;;  %2658 = vmatpush3.msra.mxu1 %v1764_v16  ;;  %v2223_v15 = vld [vmem:[%s3323_s10] sm:$0xff]  ;;  %v2224_v16 = vld [vmem:[%s3323_s10 + $0x8] sm:$0xff] }
 0xe1f   :  { %2667 = vmatprep.subr.mxu1 %v2860_v46 }
 0xe21   :  { %v1914_v25 = vpop.permute.xlu0 %1913 }
 0xe28   :  { %v2794_v17 = vpop.eup %2793 }
 0xe29   :  { %v1758_v18 = vsel %vm226_vm6, %v2794_v17, 0.0 }
 0xe2a   :  { %1759 = vadd.xlane.f32.xlu1 %v1758_v18  ;;  %v2720_v18 = vpack.c.bf16 %v2224_v16, %v2223_v15 }
 0xe3b   :  { %1915 = vrot.lane.b32.xlu1 %v3005_v49, %s2869_s17 }
 0xeb7   :  { %v1760_v19 = vpop.xlane.xlu1 %1759 }
 0xeb8   :  { %2795 = vrcp.f32 %v1760_v19  ;;  %v2226_v19 = vld [vmem:[%s3323_s10 + $0x18] sm:$0xff] }
 0xebb   :  { %v1916_v24 = vpop.permute.xlu1 %1915 }
 0xec2   :  { %v2796_v21 = vpop.eup %2795 }
 0xec3   :  { %v1762_v23 = vmul.f32 %v2796_v21, %v2794_v17  ;;  %v2225_v17 = vld [vmem:[%s3323_s10 + $0x10] sm:$0xff] }
 0xec4   :  { %v2724_v21 = vpack.c.bf16 %v2226_v19, %v2225_v17 }
 0xec5   :  { %2660 = vmatmul.mubr.msk.f32.vlgmr.msra.gmra.mrb[18].mxu1 %vm226_vm6, %v1762_v23  ;;  %v2317_v23 = vld [vmem:[%s3325_s12] sm:$0xff] }
 0xec6   :  { %2668 = vmatpush3.xpose.msk.msra.mxu1 %vm226_vm6, %v1916_v24  ;;  %2669 = vmatprep.mubr.msk.f32.mxu1 %vm2861_vm5, %v2860_v46  ;;  %v2318_v24 = vld [vmem:[%s3325_s12 + $0x8] sm:$0xff] }
 0xec7   :  { %2677 = vmatprep.subr.mxu1 %v2860_v46 }
 0xec9   :  { %2670 = vmatmul.mubr.msk.f32.vlgmr.msra.gmra.mrb[20].mxu1 %vm226_vm6, %v1914_v25  ;;  %v2319_v25 = vld [vmem:[%s3325_s12 + $0x10] sm:$0xff] }
 0xeca   :  { %2678 = vmatpush3.msra.mxu1 %v3147_v22  ;;  %2679 = vmatprep.mubr.msk.f32.mxu1 %vm2861_vm5, %v2860_v46  ;;  %v2472_v22 = vld [vmem:[%s3320_s7] ss:$0 sm:$0xff] }
 0xecb   :  { %v3225_v57 = vadd.f32 %v2472_v22, %v2154_v30  ;;  %v2321_v30 = vld [vmem:[%s3325_s12 + $0x20] sm:$0xff] }
 0xf98   :  { %v1835_v26 = vpop.f32.mrb[18].mxu1 }
 0xf99   :  { %v2661_v27 = vpop.f32.mrb[19].mxu1  ;;  %2665 = vmatmul.mubr.msk.f32.vlgmr.msra.gmra.mrb[22].mxu0 %vm226_vm6, %v1835_v26  ;;  %v2728_v26 = vpack.c.bf16 %v2318_v24, %v2317_v23 }
 0xf9a   :  { %2674 = vmatprep.mubr.msk.f32.mxu0 %vm2861_vm5, %v2860_v46  ;;  %v2167_v46 = vsel %vm66_vm0, %v3225_v57, 0.0  ;;  %v2320_v27 = vld [vmem:[%s3325_s12 + $0x18] sm:$0xff] }
 0xf9b   :  { %2729 = vmatprep.subr.bf16.mxu1 %v2728_v26 }
 0xf9c   :  { %v1987_v29 = vpop.f32.mrb[20].mxu1 }
 0xf9d   :  { %v1991_v31 = vmul.f32 0.35355338, %v1987_v29  ;;  %v2671_v32 = vpop.f32.mrb[21].mxu1  ;;  %v2732_v29 = vpack.c.bf16 %v2320_v27, %v2319_v25 }
 0xf9f   :  { %v1992_v33 = vadd.f32 %v1991_v31, %v3156_v20  ;;  %v2322_v31 = vld [vmem:[%s3325_s12 + $0x28] sm:$0xff] }
 0xfa0   :  { %v2736_v32 = vpack.c.bf16 %v2322_v31, %v2321_v30 }
 0xfa1   :  { %v1993_v34 = vsel %vm226_vm6, %v1992_v33, -inf }
 0xfa2   :  { %1994 = vmax.xlane.f32.xlu1 %v1993_v34 }
 0xfa6   :  { %2168 = vadd.xlane.f32.xlu1 %v2167_v46 }
0x102f   :  { %v1995_v35 = vpop.xlane.xlu1 %1994 }
0x1030   :  { %v1996_v59 = vsub.f32 %v1992_v33, %v1995_v35 }
0x1032   :  { %v1997_v0 = vmul.f32 1.442695, %v1996_v59 }
0x1033   :  { %v2169_v47 = vpop.xlane.xlu1 %2168 }
0x1034   :  { %2797 = vpow2.f32 %v1997_v0  ;;  %v2173_v48 = vmul.f32 0.03125, %v2169_v47 }
0x1036   :  { %v2175_v53 = vsub.f32 %v3225_v57, %v2173_v48 }
0x1038   :  { %v2177_v58 = vmul.f32 %v2175_v53, %v2175_v53  ;;  %v2207_v60 = vmul.f32 %v2473_v12, %v2175_v53 }
0x103a   :  { %v2179_v61 = vsel %vm66_vm0, %v2177_v58, 0.0 }
0x103e   :  { %v2798_v36 = vpop.eup %2797 }
0x103f   :  { %v1999_v37 = vsel %vm226_vm6, %v2798_v36, 0.0 }
0x1040   :  { %2000 = vadd.xlane.f32.xlu0 %v1999_v37 }
0x1056   :  { %2004 = vrot.lane.b32.xlu0 %v3005_v49, %s2872_s2 }
0x106c   :  { %v1908_v20 = vpop.f32.mrb[22].mxu0 }
0x106d   :  { %v1912_v38 = vadd.f32 %v1908_v20, %v1669_v9  ;;  %v2666_v39 = vpop.f32.mrb[23].mxu0 }
0x10cd   :  { %v2001_v40 = vpop.xlane.xlu0 %2000 }
0x10ce   :  { %2799 = vrcp.f32 %v2001_v40  ;;  %v2323_v40 = vld [vmem:[%s3325_s12 + $0x30] sm:$0xff] }
0x10d1   :  { %v2005_v41 = vpop.permute.xlu0 %2004 }
0x10d2   :  { %2673 = vmatpush3.msra.mxu0 %v2005_v41  ;;  %v2324_v41 = vld [vmem:[%s3325_s12 + $0x38] sm:$0xff]  ;;  %s2873_s12 = smov [#allocation5]  }
0x10d3   :  { %2721 = vmatprep.subr.bf16.mxu0 %v2720_v18  ;;  %s2423_s28 = sshll.u32 %s2873_s12, 4  ;;  %s2424_s28 = int_to_ptr.vmem [resolvable:$true] %s2423_s28 }
0x10d4   :  { %p2836_p9 = scmp.lt.s32.totalorder %s2424_s28, %s2424_s28 }
0x10d8   :  { %v2800_v42 = vpop.eup %2799 }
0x10d9   :  { %v2003_v43 = vmul.f32 %v2800_v42, %v2798_v36  ;;  %v2740_v42 = vpack.c.bf16 %v2324_v41, %v2323_v40 }
0x10db   :  { %2675 = vmatmul.mubr.msk.f32.vlgmr.msra.gmra.mrb[24].mxu0 %vm226_vm6, %v2003_v43  ;;  %v2475_v43 = vld [vmem:[%s3324_s11] ss:$0 sm:$0xff]  ;;  %s2831_s11 = scalar_lea.vmem %s2424_s28, 256 }
0x10dc   :  { %2723 = vmatpush3.bf16.msra.mxu0 %v2720_v18  ;;  %p2832_p8 = scmp.ne.s32.totalorder %s2424_s28, %s2831_s11  ;;  %p2837_p10 = scmp.lt.s32.totalorder %s2831_s11, %s2831_s11 }
0x10dd   :  { %2725 = vmatprep.subr.bf16.mxu0 %v2724_v21 }
0x10de   :  { %p2838_p11 = por %p2837_p10, %p2836_p9 }
0x10e0   :  { %2727 = vmatpush3.bf16.msra.mxu0 %v2724_v21  ;;  %p2839_p12 = pnand %p2838_p11, %p2832_p8 }
0x11ae   :  { %v2076_v44 = vpop.f32.mrb[24].mxu0 }
0x11af   :  { %v2676_v45 = vpop.f32.mrb[25].mxu0  ;;  %2680 = vmatmul.mubr.msk.f32.vlgmr.msra.gmra.mrb[22].mxu1 %vm226_vm6, %v2076_v44 }
0x11b0   :  { %2731 = vmatpush3.bf16.msra.mxu1 %v2728_v26 }
0x11b1   :  { %2733 = vmatprep.subr.bf16.mxu1 %v2732_v29 }
0x11b4   :  { %2735 = vmatpush3.bf16.msra.mxu1 %v2732_v29 }
0x11b5   :  { %2737 = vmatprep.subr.bf16.mxu1 %v2736_v32 }
0x11b8   :  { %2739 = vmatpush3.bf16.msra.mxu1 %v2736_v32 }
0x11b9   :  { %2741 = vmatprep.subr.bf16.mxu1 %v2740_v42 }
0x11bc   :  { %2743 = vmatpush3.bf16.msra.mxu1 %v2740_v42 }
0x1282   :  { %v2149_v50 = vpop.f32.mrb[22].mxu1 }
0x1283   :  { %v2153_v52 = vadd.f32 %v2149_v50, %v1912_v38  ;;  %v2681_v49 = vpop.f32.mrb[23].mxu1 }
0x1284   :  { %v2478_v49 = vld [vmem:[%s3326_s13] ss:$0 sm:$0xff] }
0x1285   :  { %v2155_v54 = vadd.f32 %v2153_v52, %v2966_v1 }
0x1287   :  { %v3237_v55 = vadd.f32 %v2472_v22, %v2155_v54 }
0x1289   :  { %v2170_v56 = vsel %vm66_vm0, %v3237_v55, 0.0 }
0x128a   :  { %2171 = vadd.xlane.f32.xlu1 %v2170_v56 }
0x128e   :  { %2180 = vadd.xlane.f32.xlu1 %v2179_v61 }
0x1317   :  { %v2172_v63 = vpop.xlane.xlu1 %2171 }
0x1318   :  { %v2174_v2 = vmul.f32 0.03125, %v2172_v63 }
0x131a   :  { %v2176_v3 = vsub.f32 %v3237_v55, %v2174_v2 }
0x131b   :  { %v2181_v4 = vpop.xlane.xlu1 %2180 }
0x131c   :  { %v2185_v5 = vmul.f32 0.032258064, %v2181_v4  ;;  %v2178_v28 = vmul.f32 %v2176_v3, %v2176_v3  ;;  %v2208_v37 = vmul.f32 %v2473_v12, %v2176_v3 }
0x131e   :  { %2801 = vrsqrt.f32 %v2185_v5  ;;  %v2182_v1 = vsel %vm66_vm0, %v2178_v28, 0.0  ;;  %vm2189_vm8 = vcmp.eq.f32.partialorder %v2185_v5, inf  ;;  %v2192_v8 = vand.u32 2147483648, %v2185_v5 }
0x131f   :  { %2183 = vadd.xlane.f32.xlu1 %v2182_v1  ;;  %vm2191_vm9 = vcmp.eq.f32.partialorder %v2185_v5, 0.0 }
0x1328   :  { %v2802_v6 = vpop.eup %2801 }
0x1329   :  { %v2188_v7 = vmul.f32 %v2802_v6, %v2185_v5 }
0x132b   :  { %v2190_v9 = vsel %vm2189_vm8, %v2185_v5, %v2188_v7 }
0x132c   :  { %v2193_v10 = vsel %vm2191_vm9, %v2192_v8, %v2190_v9 }
0x132d   :  { %v2209_v11 = vadd.f32 1e-06, %v2193_v10 }
0x132f   :  { %2803 = vrcp.f32 %v2209_v11 }
0x1339   :  { %v2804_v13 = vpop.eup %2803 }
0x133a   :  { %v2212_v62 = vmul.f32 %v2804_v13, %v2207_v60 }
0x133c   :  { %v2221_v14 = vadd.f32 %v2474_v51, %v2212_v62 }
0x133e   :  { %2690 = vmatprep.mubr.msk.f32.mxu0 %vm66_vm0, %v2221_v14 }
0x13ac   :  { %v2184_v22 = vpop.xlane.xlu1 %2183 }
0x13ad   :  { %v2186_v33 = vmul.f32 0.032258064, %v2184_v22 }
0x13af   :  { %2805 = vrsqrt.f32 %v2186_v33  ;;  %vm2196_vm10 = vcmp.eq.f32.partialorder %v2186_v33, inf  ;;  %v2199_v35 = vand.u32 2147483648, %v2186_v33  ;;  %vm2198_vm11 = vcmp.eq.f32.partialorder %v2186_v33, 0.0 }
0x13b9   :  { %v2806_v34 = vpop.eup %2805 }
0x13ba   :  { %v2195_v46 = vmul.f32 %v2806_v34, %v2186_v33 }
0x13bc   :  { %v2197_v59 = vsel %vm2196_vm10, %v2186_v33, %v2195_v46 }
0x13bd   :  { %v2200_v0 = vsel %vm2198_vm11, %v2199_v35, %v2197_v59 }
0x13be   :  { %v2210_v36 = vadd.f32 1e-06, %v2200_v0 }
0x13c0   :  { %2807 = vrcp.f32 %v2210_v36 }
0x13ca   :  { %v2808_v20 = vpop.eup %2807 }
0x13cb   :  { %v2214_v38 = vmul.f32 %v2808_v20, %v2208_v37 }
0x13cd   :  { %v2222_v39 = vadd.f32 %v2474_v51, %v2214_v38 }
0x13cf   :  { %2691 = vmatmul.mubr.msk.f32.vlgmr.msra.gmra.mrb[26].mxu0 %vm66_vm0, %v2222_v39 }
0x14a2   :  { %v2692_v44 = vpop.f32.mrb[26].mxu0 }
0x14a3   :  { %v2312_v45 = vadd.f32 %v2692_v44, %v2475_v43  ;;  %v2306_v47 = vpop.f32.mrb[27].mxu0 }
0x14a4   :  { %v2307_v48 = vadd.f32 %v2475_v43, %v2306_v47 }
0x14a5   :  { %v2316_v52 = vmax.f32 %v2312_v45, 0.0 }
0x14a6   :  { %v2315_v50 = vmax.f32 %v2307_v48, 0.0 }
0x14a8   :  { %2709 = vmatprep.mubr.msk.f32.mxu1 %vm2332_vm12, %v2315_v50 }
0x14a9   :  { %2710 = vmatmul.mubr.msk.f32.vlgmr.msra.gmra.mrb[24].mxu1 %vm2332_vm12, %v2316_v52 }
0x157c   :  { %v2711_v53 = vpop.f32.mrb[24].mxu1 }
0x157d   :  { %v2411_v54 = vadd.f32 %v2711_v53, %v2478_v49  ;;  %v2405_v56 = vpop.f32.mrb[25].mxu1 }
0x157e   :  { %v2406_v58 = vadd.f32 %v2478_v49, %v2405_v56 }
0x157f   :  { %v2415_v61 = vadd.f32 %v2411_v54, %v3237_v55 }
0x1580   :  { %v2414_v63 = vadd.f32 %v2406_v58, %v3225_v57 }
0x1581   :  { %2417 = vst.msk [vmem:[#allocation5 + $0x8] sm:$0xff] %vm66_vm0, %v2415_v61 }
0x1582   :  { %2416 = vst.msk [vmem:[#allocation5] sm:$0xff] %vm66_vm0, %v2414_v63 }
0x1583   :  { %2842 = shalt.err (!%p2839_p12)
}
0x1584   :  { %s2843_s8 = scalar_lea.hbm %s3327_s14, 256 }
0x1585   :  { %p2844_p13 = scmp.ne.s32.totalorder %s3327_s14, %s2843_s8  ;;  %p2847_p0 = scmp.lt.u32.totalorder %s2843_s8, %s3327_s14 }
0x1587   :  { %p2849_p1 = pnand %p2847_p0, %p2844_p13 }
0x1589   :  { %2852 = shalt.err (!%p2849_p1)
}
0x158a   :  { %2429 = dma.vmem_to_hbm [thread:$0]  %s2424_s28, 256, %s3327_s14, [#allocation4], %s2858_s23, %s2858_s23, %s2859_s24  }
0x158b   :  { %2855 = dma.done.wait [#allocation4], 256  }
0x158c   :  { %2856 = vsyncadd [#allocation4], 4294967040 }
0x158d   :  { %2433 = vsyncpa [#allocation3], 1 }
0x158e   :  { %2434 = vsyncpa [#allocation4], 1 }

</bundles_post_ra>
